<compile_context>
chip_gen: v7x
topology: tpu7x:2x2x1
jax: 0.10.0
libtpu: 0.0.40
codegen_flags: <defaults>
</compile_context>

<pallas_src>
import jax
import jax.numpy as jnp
from jax.experimental import pallas as pl
from jax.experimental.pallas import tpu as pltpu

_LANE = 128     # TPU vreg lane width
_SUBLANE = 8    # TPU vreg sublane count (f32)


def _round_up(x, m):
    return (x + m - 1) // m * m


def bow_ffnn_kernel(ids_ref, table_ref, w1_ref, b1_ref, w2_ref, b2_ref, out_ref):
    seq = ids_ref.shape[0]
    m_rows = out_ref.shape[0]          # sublane-padded bag rows (all identical)
    vocab_p = table_ref.shape[0]

    # ---- EmbeddingBag(mode='mean'), single bag (offsets = [0]) -----------------
    # Build an (m_rows, vocab_p) token-count matrix from the SMEM-prefetched ids
    # and do the pooling as one MXU matmul:  bag = counts @ table * (1/seq).
    # counts stay register-resident; no scratch, no per-token VMEM store.
    vocab_iota = jax.lax.broadcasted_iota(jnp.int32, (m_rows, vocab_p), 1)
    counts = jnp.zeros((m_rows, vocab_p), jnp.float32)
    for t in range(seq):               # static unroll; VPU compare + add
        counts = counts + (vocab_iota == ids_ref[t]).astype(jnp.float32)

    bag = jnp.dot(counts, table_ref[...],
                  preferred_element_type=jnp.float32,
                  precision=jax.lax.Precision.HIGHEST) * (1.0 / seq)

    # ---- FFNN: Linear -> ReLU -> Linear -----------------------------------------
    # TODO(synk): FFNN submodule definition is not shown in the source; assumed the
    #             conventional Linear -> ReLU -> Linear.
    h = jnp.dot(bag, w1_ref[...], preferred_element_type=jnp.float32,
                precision=jax.lax.Precision.HIGHEST) + b1_ref[...]
    h = jnp.maximum(h, 0.0)
    logits = jnp.dot(h, w2_ref[...], preferred_element_type=jnp.float32,
                     precision=jax.lax.Precision.HIGHEST) + b2_ref[...]

    # ---- log_softmax over classes (padded classes carry a -1e30 bias -> exp==0) --
    m = jnp.max(logits, axis=-1, keepdims=True)
    shifted = logits - m
    lse = jnp.log(jnp.sum(jnp.exp(shifted), axis=-1, keepdims=True))
    out_ref[...] = shifted - lse


def bow_ffnn_forward(ids, table, w1, b1, w2, b2):
    vocab, embed_dim = table.shape
    hidden = w1.shape[1]
    out_size = w2.shape[1]

    vocab_p = _round_up(vocab, _LANE)
    embed_p = _round_up(embed_dim, _LANE)
    hidden_p = _round_up(hidden, _LANE)
    out_p = _round_up(out_size, _LANE)
    m_rows = _SUBLANE

    f32 = jnp.float32
    # Zero-pad all weights to lane-dense 128-wide tiles (zeros are inert through the
    # matmuls / ReLU); pad the output bias with -1e30 so padded classes drop out of
    # log_softmax.  Biases are pre-broadcast to the 8 padded bag rows.
    table_p = jnp.zeros((vocab_p, embed_p), f32).at[:vocab, :embed_dim].set(table.astype(f32))
    w1_p = jnp.zeros((embed_p, hidden_p), f32).at[:embed_dim, :hidden].set(w1.astype(f32))
    b1_p = jnp.zeros((m_rows, hidden_p), f32).at[:, :hidden].set(
        jnp.broadcast_to(b1.astype(f32), (m_rows, hidden)))
    w2_p = jnp.zeros((hidden_p, out_p), f32).at[:hidden, :out_size].set(w2.astype(f32))
    b2_p = jnp.full((m_rows, out_p), -1e30, f32).at[:, :out_size].set(
        jnp.broadcast_to(b2.astype(f32), (m_rows, out_size)))

    ids32 = jnp.clip(ids.astype(jnp.int32), 0, vocab - 1)   # keep ids in-range

    out_padded = pl.pallas_call(
        bow_ffnn_kernel,
        out_shape=jax.ShapeDtypeStruct((m_rows, out_p), f32),
        grid_spec=pltpu.PrefetchScalarGridSpec(
            num_scalar_prefetch=1,            # ids -> SMEM, readable per element
            grid=(1,),                        # single bag (offsets == [0])
            in_specs=[
                pl.BlockSpec((vocab_p, embed_p), lambda i, ids: (0, 0)),
                pl.BlockSpec((embed_p, hidden_p), lambda i, ids: (0, 0)),
                pl.BlockSpec((m_rows, hidden_p), lambda i, ids: (0, 0)),
                pl.BlockSpec((hidden_p, out_p), lambda i, ids: (0, 0)),
                pl.BlockSpec((m_rows, out_p), lambda i, ids: (0, 0)),
            ],
            out_specs=pl.BlockSpec((m_rows, out_p), lambda i, ids: (0, 0)),
        ),
        compiler_params=pltpu.CompilerParams(
            dimension_semantics=("arbitrary",)),
    )(ids32, table_p, w1_p, b1_p, w2_p, b2_p)

    # Drop sublane / lane padding -> (1, output_size) log-probabilities.
    return out_padded[0:1, :out_size]


def reference_forward(ids, table, w1, b1, w2, b2):
    bag = jnp.mean(table[ids], axis=0, keepdims=True)
    h = jnp.maximum(jnp.dot(bag, w1, precision=jax.lax.Precision.HIGHEST) + b1, 0.0)
    logits = jnp.dot(h, w2, precision=jax.lax.Precision.HIGHEST) + b2
    return jax.nn.log_softmax(logits, axis=-1)


if __name__ == "__main__":
    vocab, embed_dim, hidden, out_size, seq = 50, 32, 32, 8, 8

    key = jax.random.PRNGKey(0)
    k_tab, k_w1, k_b1, k_w2, k_b2, k_ids = jax.random.split(key, 6)

    table = jax.random.normal(k_tab, (vocab, embed_dim), dtype=jnp.float32) * 0.1
    w1 = jax.random.normal(k_w1, (embed_dim, hidden), dtype=jnp.float32) * 0.1
    b1 = jax.random.normal(k_b1, (1, hidden), dtype=jnp.float32) * 0.1
    w2 = jax.random.normal(k_w2, (hidden, out_size), dtype=jnp.float32) * 0.1
    b2 = jax.random.normal(k_b2, (1, out_size), dtype=jnp.float32) * 0.1
    ids = jax.random.randint(k_ids, (seq,), 0, vocab, dtype=jnp.int32)

    out = bow_ffnn_forward(ids, table, w1, b1, w2, b2)
    jax.block_until_ready(out)

    ref = reference_forward(ids, table, w1, b1, w2, b2)
    assert out.shape == (1, out_size)
    assert jnp.allclose(out, ref, atol=1e-4, rtol=1e-4), (out, ref)

    print("KERNEL_OK")
</pallas_src>

<mosaic_0001>
module attributes {stable_mosaic.version = 11 : i64} {
  func.func @bow_ffnn_kernel(%arg0: i32, %arg1: memref<8xi32, #tpu.memory_space<smem>>, %arg2: memref<128x128xf32, #tpu.memory_space<vmem>>, %arg3: memref<128x128xf32, #tpu.memory_space<vmem>>, %arg4: memref<8x128xf32, #tpu.memory_space<vmem>>, %arg5: memref<128x128xf32, #tpu.memory_space<vmem>>, %arg6: memref<8x128xf32, #tpu.memory_space<vmem>>, %arg7: memref<8x128xf32, #tpu.memory_space<vmem>>) attributes {dimension_semantics = [#tpu.dimension_semantics<arbitrary>], iteration_bounds = array<i64: 1>, scalar_prefetch = 1 : i64, scratch_operands = 0 : i64, tpu.core_type = #tpu.core_type<tc>, window_params = [{pipeline_mode = #tpu.pipeline_mode<synchronous>, transform_indices = @transform_0, window_bounds = array<i64: 128, 128>}, {pipeline_mode = #tpu.pipeline_mode<synchronous>, transform_indices = @transform_1, window_bounds = array<i64: 128, 128>}, {pipeline_mode = #tpu.pipeline_mode<synchronous>, transform_indices = @transform_2, window_bounds = array<i64: 8, 128>}, {pipeline_mode = #tpu.pipeline_mode<synchronous>, transform_indices = @transform_3, window_bounds = array<i64: 128, 128>}, {pipeline_mode = #tpu.pipeline_mode<synchronous>, transform_indices = @transform_4, window_bounds = array<i64: 8, 128>}, {pipeline_mode = #tpu.pipeline_mode<synchronous>, transform_indices = @transform_5, window_bounds = array<i64: 8, 128>}]} {
    %0 = tpu.iota {dimensions = array<i32: 1>} : vector<8x128xi32>
    %cst = arith.constant 0.000000e+00 : f32
    %1 = vector.broadcast %cst : f32 to vector<8x128xf32>
    %c0 = arith.constant 0 : index
    %2 = memref.load %arg1[%c0] : memref<8xi32, #tpu.memory_space<smem>>
    %3 = vector.broadcast %2 : i32 to vector<8x128xi32>
    %4 = arith.cmpi eq, %0, %3 : vector<8x128xi32>
    %5 = arith.extui %4 : vector<8x128xi1> to vector<8x128xi32>
    %6 = arith.sitofp %5 : vector<8x128xi32> to vector<8x128xf32>
    %7 = arith.addf %1, %6 : vector<8x128xf32>
    %c1 = arith.constant 1 : index
    %8 = memref.load %arg1[%c1] : memref<8xi32, #tpu.memory_space<smem>>
    %9 = vector.broadcast %8 : i32 to vector<8x128xi32>
    %10 = arith.cmpi eq, %0, %9 : vector<8x128xi32>
    %11 = arith.extui %10 : vector<8x128xi1> to vector<8x128xi32>
    %12 = arith.sitofp %11 : vector<8x128xi32> to vector<8x128xf32>
    %13 = arith.addf %7, %12 : vector<8x128xf32>
    %c2 = arith.constant 2 : index
    %14 = memref.load %arg1[%c2] : memref<8xi32, #tpu.memory_space<smem>>
    %15 = vector.broadcast %14 : i32 to vector<8x128xi32>
    %16 = arith.cmpi eq, %0, %15 : vector<8x128xi32>
    %17 = arith.extui %16 : vector<8x128xi1> to vector<8x128xi32>
    %18 = arith.sitofp %17 : vector<8x128xi32> to vector<8x128xf32>
    %19 = arith.addf %13, %18 : vector<8x128xf32>
    %c3 = arith.constant 3 : index
    %20 = memref.load %arg1[%c3] : memref<8xi32, #tpu.memory_space<smem>>
    %21 = vector.broadcast %20 : i32 to vector<8x128xi32>
    %22 = arith.cmpi eq, %0, %21 : vector<8x128xi32>
    %23 = arith.extui %22 : vector<8x128xi1> to vector<8x128xi32>
    %24 = arith.sitofp %23 : vector<8x128xi32> to vector<8x128xf32>
    %25 = arith.addf %19, %24 : vector<8x128xf32>
    %c4 = arith.constant 4 : index
    %26 = memref.load %arg1[%c4] : memref<8xi32, #tpu.memory_space<smem>>
    %27 = vector.broadcast %26 : i32 to vector<8x128xi32>
    %28 = arith.cmpi eq, %0, %27 : vector<8x128xi32>
    %29 = arith.extui %28 : vector<8x128xi1> to vector<8x128xi32>
    %30 = arith.sitofp %29 : vector<8x128xi32> to vector<8x128xf32>
    %31 = arith.addf %25, %30 : vector<8x128xf32>
    %c5 = arith.constant 5 : index
    %32 = memref.load %arg1[%c5] : memref<8xi32, #tpu.memory_space<smem>>
    %33 = vector.broadcast %32 : i32 to vector<8x128xi32>
    %34 = arith.cmpi eq, %0, %33 : vector<8x128xi32>
    %35 = arith.extui %34 : vector<8x128xi1> to vector<8x128xi32>
    %36 = arith.sitofp %35 : vector<8x128xi32> to vector<8x128xf32>
    %37 = arith.addf %31, %36 : vector<8x128xf32>
    %c6 = arith.constant 6 : index
    %38 = memref.load %arg1[%c6] : memref<8xi32, #tpu.memory_space<smem>>
    %39 = vector.broadcast %38 : i32 to vector<8x128xi32>
    %40 = arith.cmpi eq, %0, %39 : vector<8x128xi32>
    %41 = arith.extui %40 : vector<8x128xi1> to vector<8x128xi32>
    %42 = arith.sitofp %41 : vector<8x128xi32> to vector<8x128xf32>
    %43 = arith.addf %37, %42 : vector<8x128xf32>
    %c7 = arith.constant 7 : index
    %44 = memref.load %arg1[%c7] : memref<8xi32, #tpu.memory_space<smem>>
    %45 = vector.broadcast %44 : i32 to vector<8x128xi32>
    %46 = arith.cmpi eq, %0, %45 : vector<8x128xi32>
    %47 = arith.extui %46 : vector<8x128xi1> to vector<8x128xi32>
    %48 = arith.sitofp %47 : vector<8x128xi32> to vector<8x128xf32>
    %49 = arith.addf %43, %48 : vector<8x128xf32>
    %c0_0 = arith.constant 0 : index
    %c0_1 = arith.constant 0 : index
    %50 = vector.load %arg2[%c0_0, %c0_1] : memref<128x128xf32, #tpu.memory_space<vmem>>, vector<128x128xf32>
    %cst_2 = arith.constant dense<0.000000e+00> : vector<8x128xf32>
    %51 = tpu.matmul %49, %50, %cst_2 {dimension_numbers = #tpu.dot_dimension_numbers<[1], [0], [0], [1], [0, 0, 1, 1], [], []>, precision = #tpu.contract_precision<fp32>} : vector<8x128xf32>, vector<128x128xf32>, vector<8x128xf32> -> vector<8x128xf32>
    %cst_3 = arith.constant 1.250000e-01 : f32
    %52 = vector.broadcast %cst_3 : f32 to vector<8x128xf32>
    %53 = arith.mulf %51, %52 : vector<8x128xf32>
    %c0_4 = arith.constant 0 : index
    %c0_5 = arith.constant 0 : index
    %54 = vector.load %arg3[%c0_4, %c0_5] : memref<128x128xf32, #tpu.memory_space<vmem>>, vector<128x128xf32>
    %cst_6 = arith.constant dense<0.000000e+00> : vector<8x128xf32>
    %55 = tpu.matmul %53, %54, %cst_6 {dimension_numbers = #tpu.dot_dimension_numbers<[1], [0], [0], [1], [0, 0, 1, 1], [], []>, precision = #tpu.contract_precision<fp32>} : vector<8x128xf32>, vector<128x128xf32>, vector<8x128xf32> -> vector<8x128xf32>
    %c0_7 = arith.constant 0 : index
    %c0_8 = arith.constant 0 : index
    %56 = vector.load %arg4[%c0_7, %c0_8] : memref<8x128xf32, #tpu.memory_space<vmem>>, vector<8x128xf32>
    %57 = arith.addf %55, %56 : vector<8x128xf32>
    %cst_9 = arith.constant 0.000000e+00 : f32
    %58 = vector.broadcast %cst_9 : f32 to vector<8x128xf32>
    %59 = arith.maximumf %57, %58 : vector<8x128xf32>
    %c0_10 = arith.constant 0 : index
    %c0_11 = arith.constant 0 : index
    %60 = vector.load %arg5[%c0_10, %c0_11] : memref<128x128xf32, #tpu.memory_space<vmem>>, vector<128x128xf32>
    %cst_12 = arith.constant dense<0.000000e+00> : vector<8x128xf32>
    %61 = tpu.matmul %59, %60, %cst_12 {dimension_numbers = #tpu.dot_dimension_numbers<[1], [0], [0], [1], [0, 0, 1, 1], [], []>, precision = #tpu.contract_precision<fp32>} : vector<8x128xf32>, vector<128x128xf32>, vector<8x128xf32> -> vector<8x128xf32>
    %c0_13 = arith.constant 0 : index
    %c0_14 = arith.constant 0 : index
    %62 = vector.load %arg6[%c0_13, %c0_14] : memref<8x128xf32, #tpu.memory_space<vmem>>, vector<8x128xf32>
    %63 = arith.addf %61, %62 : vector<8x128xf32>
    %cst_15 = arith.constant dense<0xFF800000> : vector<8xf32>
    %64 = vector.multi_reduction <maximumf>, %63, %cst_15 [1] : vector<8x128xf32> to vector<8xf32>
    %65 = vector.shape_cast %64 : vector<8xf32> to vector<8x1xf32>
    %66 = vector.broadcast %65 : vector<8x1xf32> to vector<8x128xf32>
    %67 = arith.subf %63, %66 : vector<8x128xf32>
    %68 = math.exp %67 : vector<8x128xf32>
    %cst_16 = arith.constant dense<0.000000e+00> : vector<8xf32>
    %69 = vector.multi_reduction <add>, %68, %cst_16 [1] : vector<8x128xf32> to vector<8xf32>
    %70 = vector.shape_cast %69 : vector<8xf32> to vector<8x1xf32>
    %71 = math.log %70 : vector<8x1xf32>
    %72 = vector.broadcast %71 : vector<8x1xf32> to vector<8x128xf32>
    %73 = arith.subf %67, %72 : vector<8x128xf32>
    %c0_17 = arith.constant 0 : index
    %c0_18 = arith.constant 0 : index
    %74 = vector.load %arg7[%c0_17, %c0_18] : memref<8x128xf32, #tpu.memory_space<vmem>>, vector<8x128xf32>
    tpu.vector_store %arg7[%c0_17, %c0_18], %73 {strides = array<i32>} : memref<8x128xf32, #tpu.memory_space<vmem>>, vector<8x128xf32>,
    return
  }
  func.func @transform_0(%arg0: i32, %arg1: memref<8xi32, #tpu.memory_space<smem>>) -> (i32, i32) {
    %c0_i32 = arith.constant 0 : i32
    %c0_i32_0 = arith.constant 0 : i32
    %c0_i32_1 = arith.constant 0 : i32
    return %c0_i32, %c0_i32_0 : i32, i32
  }
  func.func @transform_1(%arg0: i32, %arg1: memref<8xi32, #tpu.memory_space<smem>>) -> (i32, i32) {
    %c0_i32 = arith.constant 0 : i32
    %c0_i32_0 = arith.constant 0 : i32
    %c0_i32_1 = arith.constant 0 : i32
    return %c0_i32, %c0_i32_0 : i32, i32
  }
  func.func @transform_2(%arg0: i32, %arg1: memref<8xi32, #tpu.memory_space<smem>>) -> (i32, i32) {
    %c0_i32 = arith.constant 0 : i32
    %c0_i32_0 = arith.constant 0 : i32
    %c0_i32_1 = arith.constant 0 : i32
    return %c0_i32, %c0_i32_0 : i32, i32
  }
  func.func @transform_3(%arg0: i32, %arg1: memref<8xi32, #tpu.memory_space<smem>>) -> (i32, i32) {
    %c0_i32 = arith.constant 0 : i32
    %c0_i32_0 = arith.constant 0 : i32
    %c0_i32_1 = arith.constant 0 : i32
    return %c0_i32, %c0_i32_0 : i32, i32
  }
  func.func @transform_4(%arg0: i32, %arg1: memref<8xi32, #tpu.memory_space<smem>>) -> (i32, i32) {
    %c0_i32 = arith.constant 0 : i32
    %c0_i32_0 = arith.constant 0 : i32
    %c0_i32_1 = arith.constant 0 : i32
    return %c0_i32, %c0_i32_0 : i32, i32
  }
  func.func @transform_5(%arg0: i32, %arg1: memref<8xi32, #tpu.memory_space<smem>>) -> (i32, i32) {
    %c0_i32 = arith.constant 0 : i32
    %c0_i32_0 = arith.constant 0 : i32
    %c0_i32_1 = arith.constant 0 : i32
    return %c0_i32, %c0_i32_0 : i32, i32
  }
}

</mosaic_0001>

<bundles_post_ra>
// kernel: tpu_custom_call.1
= control target key start
LH: loop header
LB: loop body
LE: loop exit
PB: predicated region body
PF: predicated region fallthrough
CT: control target
= control target key end

     0   :  { %s4775_s0 = inlined_call_operand.hbm [shape: s32[8], index: 0, kind: input, shape index: {}]   ;;  %s4776_s1 = inlined_call_operand.hbm [shape: f32[128,128], index: 1, kind: input, shape index: {}]   ;;  %s4777_s2 = inlined_call_operand.hbm [shape: f32[128,128], index: 2, kind: input, shape index: {}]   ;;  %s4778_s3 = inlined_call_operand.vmem [shape: f32[8,128], index: 3, kind: input, shape index: {}]   ;;  %s4779_s4 = inlined_call_operand.hbm [shape: f32[128,128], index: 4, kind: input, shape index: {}]   ;;  %s4780_s5 = inlined_call_operand.vmem [shape: f32[8,128], index: 5, kind: input, shape index: {}]   ;;  %s4781_s6 = inlined_call_operand.hbm [shape: f32[8,128], index: 6, kind: output, shape index: {}]  }
   0x1   :  { %s3547_s23 = scalar_lea.hbm %s4775_s0, 16 }
   0x2   :  { %p3548_p0 = scmp.ne.s32.totalorder %s4775_s0, %s3547_s23  ;;  %p3551_p1 = scmp.lt.u32.totalorder %s3547_s23, %s4775_s0 }
   0x4   :  { %p3553_p2 = pnand %p3551_p1, %p3548_p0 }
   0x6   :  { %3556 = shalt.err (!%p3553_p2)  }
   0x7   :  { %s3653_s28 = smov [#allocation3]  }
   0x8   :  { %12 = dma.hbm_to_smem %s4775_s0, 16, %s3653_s28, [#allocation2] }
   0x9   :  { %3645 = dma.done.wait [#allocation2], 16 }
   0xa   :  { %3646 = vsyncadd [#allocation2], 4294967280 }
   0xb   :  { %14 = sfence }
   0xc   :  { %15 = vsyncpa [#allocation5], 0 }
   0xd   :  { %16 = vsyncpa [#allocation8], 0 }
   0xe   :  { %17 = vsyncpa [#allocation6], 0  ;;  %s3654_s7 = smov [#allocation7]   ;;  %s3655_s9 = smov [#allocation4]  }
   0xf   :  { %s35_s8 = sshll.u32 %s3654_s7, 4  ;;  %s23_s10 = sshll.u32 %s3655_s9, 4  ;;  %s36_s8 = int_to_ptr.vmem [resolvable:$true] %s35_s8  ;;  %s3710_s10 = int_to_ptr.vmem [resolvable:$true] %s23_s10 }
  0x10   :  { %s3557_s13 = scalar_lea.hbm %s4777_s2, 2048 }
  0x11   :  { %p3558_p3 = scmp.ne.s32.totalorder %s4777_s2, %s3557_s13  ;;  %p3561_p4 = scmp.lt.u32.totalorder %s3557_s13, %s4777_s2 }
  0x13   :  { %p3563_p5 = pnand %p3561_p4, %p3558_p3 }
  0x15   :  { %3566 = shalt.err (!%p3563_p5)
}
  0x16   :  { %s3567_s17 = scalar_lea.vmem %s36_s8, 2048  ;;  %p3572_p7 = scmp.lt.s32.totalorder %s36_s8, %s36_s8 }
  0x17   :  { %p3568_p6 = scmp.ne.s32.totalorder %s36_s8, %s3567_s17  ;;  %p3573_p8 = scmp.lt.s32.totalorder %s3567_s17, %s3567_s17 }
  0x19   :  { %p3574_p9 = por %p3573_p8, %p3572_p7 }
  0x1b   :  { %p3575_p10 = pnand %p3574_p9, %p3568_p6 }
  0x1d   :  { %3578 = shalt.err (!%p3575_p10)
}
  0x1e   :  { %s3656_s18 = smov 128   ;;  %s3657_s19 = smov 8  }
  0x1f   :  { %41 = dma.hbm_to_vmem [thread:$0]  %s4777_s2, 2048, %s36_s8, [#allocation8], %s3656_s18, %s3656_s18, %s3657_s19  }
  0x20   :  { %s3579_s24 = scalar_lea.hbm %s4776_s1, 2048 }
  0x21   :  { %p3580_p11 = scmp.ne.s32.totalorder %s4776_s1, %s3579_s24  ;;  %p3583_p12 = scmp.lt.u32.totalorder %s3579_s24, %s4776_s1 }
  0x23   :  { %p3585_p13 = pnand %p3583_p12, %p3580_p11 }
  0x25   :  { %3588 = shalt.err (!%p3585_p13)
}
  0x26   :  { %s3589_s29 = scalar_lea.vmem %s3710_s10, 2048  ;;  %p3594_p1 = scmp.lt.s32.totalorder %s3710_s10, %s3710_s10 }
  0x27   :  { %p3590_p0 = scmp.ne.s32.totalorder %s3710_s10, %s3589_s29  ;;  %p3595_p2 = scmp.lt.s32.totalorder %s3589_s29, %s3589_s29 }
  0x29   :  { %p3596_p3 = por %p3595_p2, %p3594_p1 }
  0x2b   :  { %p3597_p4 = pnand %p3596_p3, %p3590_p0 }
  0x2d   :  { %3600 = shalt.err (!%p3597_p4)
}
  0x2e   :  { %29 = dma.hbm_to_vmem [thread:$0]  %s4776_s1, 2048, %s3710_s10, [#allocation5], %s3656_s18, %s3656_s18, %s3657_s19  }
  0x2f   :  { %s3658_s7 = smov [#allocation9]   ;;  %s3601_s12 = scalar_lea.hbm %s4779_s4, 2048 }
  0x30   :  { %s49_s8 = sshll.u32 %s3658_s7, 4  ;;  %p3602_p5 = scmp.ne.s32.totalorder %s4779_s4, %s3601_s12  ;;  %s50_s8 = int_to_ptr.vmem [resolvable:$true] %s49_s8 }
  0x31   :  { %p3605_p6 = scmp.lt.u32.totalorder %s3601_s12, %s4779_s4 }
  0x33   :  { %p3607_p7 = pnand %p3605_p6, %p3602_p5 }
  0x35   :  { %3610 = shalt.err (!%p3607_p7)
}
  0x36   :  { %s3611_s16 = scalar_lea.vmem %s50_s8, 2048  ;;  %p3616_p9 = scmp.lt.s32.totalorder %s50_s8, %s50_s8 }
  0x37   :  { %p3612_p8 = scmp.ne.s32.totalorder %s50_s8, %s3611_s16  ;;  %p3617_p10 = scmp.lt.s32.totalorder %s3611_s16, %s3611_s16 }
  0x39   :  { %p3618_p11 = por %p3617_p10, %p3616_p9 }
  0x3b   :  { %p3619_p12 = pnand %p3618_p11, %p3612_p8 }
  0x3d   :  { %3622 = shalt.err (!%p3619_p12)
}
  0x3e   :  { %55 = dma.hbm_to_vmem [thread:$0]  %s4779_s4, 2048, %s50_s8, [#allocation8], %s3656_s18, %s3656_s18, %s3657_s19  }
  0x3f   :  { %3647 = dma.done.wait [#allocation5], 2048  }
  0x40   :  { %3648 = vsyncadd [#allocation5], 4294965248 }
  0x41   :  { %3649 = dma.done.wait [#allocation8], 4096  }
  0x42   :  { %3650 = vsyncadd [#allocation8], 4294963200  ;;  %v4791_v0 = vmov 0.0|0.0   ;;  %vm3660_vm0 = vmmov 0   ;;  %v4785_v1 = vmov 0.0   ;;  %s69_s17 = sld [smem:[#allocation3]]  ;;  %v67_v2 = vlaneseq }
  0x43   :  { %3070 = vmatprep.subr.bf16.mxu1 %v4791_v0  ;;  %3142 = vmatprep.subr.bf16.mxu0 %v4791_v0  ;;  %s2120_s20 = sld [smem:[#allocation3 + $0x1]]  ;;  %v3768_v3 = vld [vmem:[#allocation4] sm:$0xff]  ;;  %v3770_v4 = vld [vmem:[#allocation4 + $0x8] sm:$0xff]  ;;  %v3772_v5 = vld [vmem:[#allocation4 + $0x10] sm:$0xff]  ;;  %s3784_s4 = sld [smem:[#allocation3 + $0x2]] }
  0x44   :  { %2472 = vmatprep.mubr.msk.f32.mxu1 %vm3660_vm0, %v4785_v1  ;;  %2577 = vmatprep.mubr.msk.f32.mxu0 %vm3660_vm0, %v4785_v1  ;;  %v134_v6 = vand.u32 4294901760, %v3768_v3  ;;  %v137_v7 = vand.u32 4294901760, %v3770_v4  ;;  %v3776_v8 = vld [vmem:[#allocation4 + $0x18] sm:$0xff]  ;;  %v140_v9 = vand.u32 4294901760, %v3772_v5  ;;  %v3780_v11 = vld [vmem:[#allocation4 + $0x20] sm:$0xff]  ;;  %v3782_v12 = vld [vmem:[#allocation4 + $0x28] sm:$0xff] }
  0x45   :  { %v143_v10 = vand.u32 4294901760, %v3776_v8  ;;  %v3792_v14 = vand.u32 127, %v67_v2  ;;  %s3794_s18 = sld [smem:[#allocation3 + $0x3]]  ;;  %s3796_s19 = sld [smem:[#allocation3 + $0x4]]  ;;  %v146_v18 = vand.u32 4294901760, %v3780_v11  ;;  %v149_v19 = vand.u32 4294901760, %v3782_v12 }
  0x46   :  { %v3790_v13 = vpack.c.bf16 %v137_v7, %v134_v6  ;;  %v3808_v20 = vld [vmem:[#allocation4 + $0x30] sm:$0xff]  ;;  %v3810_v21 = vld [vmem:[#allocation4 + $0x38] sm:$0xff]  ;;  %s3812_s21 = sld [smem:[#allocation3 + $0x5]]  ;;  %s3818_s22 = sld [smem:[#allocation3 + $0x6]]  ;;  %v3824_v24 = vld [vmem:[#allocation4 + $0x40] sm:$0xff]  ;;  %v3879_v49 = vsub.f32 %v3768_v3, %v134_v6  ;;  %v3884_v50 = vsub.f32 %v3770_v4, %v137_v7  ;;  %v3905_v56 = vsub.f32 %v3772_v5, %v140_v9 }
  0x47   :  { %v3804_v17 = vpack.c.bf16 %v143_v10, %v140_v9  ;;  %s3820_s23 = sld [smem:[#allocation3 + $0x7]]  ;;  %v152_v22 = vand.u32 4294901760, %v3808_v20  ;;  %v155_v23 = vand.u32 4294901760, %v3810_v21  ;;  %v3832_v25 = vpack.c.bf16 %v149_v19, %v146_v18  ;;  %v3834_v26 = vld [vmem:[#allocation4 + $0x48] sm:$0xff]  ;;  %v3853_v35 = vld [vmem:[#allocation4 + $0x50] sm:$0xff]  ;;  %v3855_v36 = vld [vmem:[#allocation4 + $0x58] sm:$0xff] }
  0x48   :  { %v70_v15 = vstv %s69_s17  ;;  %3072 = vmatpush3.bf16.msra.mxu1 %v3790_v13  ;;  %3144 = vmatpush3.bf16.msra.mxu0 %v3790_v13  ;;  %v158_v30 = vand.u32 4294901760, %v3824_v24  ;;  %v161_v33 = vand.u32 4294901760, %v3834_v26  ;;  %v164_v45 = vand.u32 4294901760, %v3853_v35  ;;  %v3894_v52 = vld [vmem:[#allocation4 + $0x60] sm:$0xff]  ;;  %v3899_v54 = vld [vmem:[#allocation4 + $0x68] sm:$0xff]  ;;  %v3932_v63 = vld [vmem:[#allocation4 + $0x70] sm:$0xff] }
  0x49   :  { %v76_v16 = vstv %s2120_s20  ;;  %3073 = vmatprep.subr.bf16.mxu1 %v4791_v0  ;;  %3145 = vmatprep.subr.bf16.mxu0 %v4791_v0  ;;  %vm71_vm1 = vcmp.eq.s32.totalorder %v3792_v14, %v70_v15  ;;  %v82_v29 = vstv %s3784_s4  ;;  %v3846_v32 = vpack.c.bf16 %v155_v23, %v152_v22  ;;  %v3942_v7 = vld [vmem:[#allocation4 + $0x78] sm:$0xff]  ;;  %s3662_s27 = smov [#allocation10]  }
  0x4a   :  { %vm77_vm2 = vcmp.eq.s32.totalorder %v3792_v14, %v76_v16  ;;  %v2119_v27 = vsel %vm71_vm1, 1.0, %v4785_v1  ;;  %vm83_vm3 = vcmp.eq.s32.totalorder %v3792_v14, %v82_v29  ;;  %v167_v46 = vand.u32 4294901760, %v3855_v36  ;;  %s2109_s28 = sshll.u32 %s3662_s27, 4  ;;  %s2110_s28 = int_to_ptr.vmem [resolvable:$true] %s2109_s28 }
  0x4b   :  { %v2121_v28 = vsel %vm77_vm2, 1.0, %v4785_v1  ;;  %v88_v34 = vstv %s3794_s18  ;;  %v2123_v37 = vsel %vm83_vm3, 1.0, %v4785_v1  ;;  %v94_v38 = vstv %s3796_s19  ;;  %p3628_p0 = scmp.lt.s32.totalorder %s2110_s28, %s2110_s28 }
  0x4c   :  { %3075 = vmatpush3.bf16.msra.mxu1 %v3804_v17  ;;  %3147 = vmatpush3.bf16.msra.mxu0 %v3804_v17  ;;  %v80_v31 = vadd.f32 %v2121_v28, %v2119_v27  ;;  %vm89_vm4 = vcmp.eq.s32.totalorder %v3792_v14, %v88_v34  ;;  %v100_v39 = vstv %s3812_s21  ;;  %vm95_vm5 = vcmp.eq.s32.totalorder %v3792_v14, %v94_v38 }
  0x4d   :  { %3076 = vmatprep.subr.bf16.mxu1 %v4791_v0  ;;  %3148 = vmatprep.subr.bf16.mxu0 %v4791_v0  ;;  %v2125_v41 = vsel %vm89_vm4, 1.0, %v4785_v1  ;;  %vm101_vm6 = vcmp.eq.s32.totalorder %v3792_v14, %v100_v39  ;;  %v2127_v42 = vsel %vm95_vm5, 1.0, %v4785_v1  ;;  %v106_v43 = vstv %s3818_s22 }
  0x4e   :  { %v86_v40 = vadd.f32 %v2123_v37, %v80_v31  ;;  %v112_v44 = vstv %s3820_s23  ;;  %vm3872_vm7 = vcmp.eq.s32.totalorder %v3792_v14, %v106_v43  ;;  %v3892_v51 = vpack.c.bf16 %v161_v33, %v158_v30 }
  0x4f   :  { %v2129_v53 = vsel %vm101_vm6, 1.0, %v4785_v1  ;;  %vm113_vm8 = vcmp.eq.s32.totalorder %v3792_v14, %v112_v44  ;;  %v3910_v57 = vsub.f32 %v3776_v8, %v143_v10  ;;  %v3915_v58 = vsub.f32 %v3780_v11, %v146_v18 }
  0x50   :  { %3078 = vmatpush3.bf16.msra.mxu1 %v3832_v25  ;;  %3150 = vmatpush3.bf16.msra.mxu0 %v3832_v25  ;;  %v92_v47 = vadd.f32 %v2125_v41, %v86_v40  ;;  %v2131_v59 = vsel %vm3872_vm7, 1.0, %v4785_v1  ;;  %v3923_v60 = vsub.f32 %v3782_v12, %v149_v19  ;;  %v3929_v61 = vpack.c.bf16 %v167_v46, %v164_v45 }
  0x51   :  { %3079 = vmatprep.subr.bf16.mxu1 %v4791_v0  ;;  %3151 = vmatprep.subr.bf16.mxu0 %v4791_v0  ;;  %v170_v62 = vand.u32 4294901760, %v3894_v52  ;;  %v173_v3 = vand.u32 4294901760, %v3899_v54  ;;  %v2133_v4 = vsel %vm113_vm8, 1.0, %v4785_v1  ;;  %v227_v5 = vand.u32 4294901760, %v3879_v49 }
  0x52   :  { %v98_v55 = vadd.f32 %v2127_v42, %v92_v47  ;;  %v234_v6 = vand.u32 4294901760, %v3884_v50  ;;  %v3947_v9 = vsub.f32 %v3808_v20, %v152_v22  ;;  %v176_v10 = vand.u32 4294901760, %v3932_v63 }
  0x53   :  { %v241_v11 = vand.u32 4294901760, %v3905_v56  ;;  %v248_v14 = vand.u32 4294901760, %v3910_v57  ;;  %v255_v15 = vand.u32 4294901760, %v3915_v58  ;;  %v262_v16 = vand.u32 4294901760, %v3923_v60 }
  0x54   :  { %3081 = vmatpush3.bf16.msra.mxu1 %v3846_v32  ;;  %3153 = vmatpush3.bf16.msra.mxu0 %v3846_v32  ;;  %v104_v2 = vadd.f32 %v2129_v53, %v98_v55  ;;  %v3960_v18 = vpack.c.bf16 %v173_v3, %v170_v62  ;;  %v179_v19 = vand.u32 4294901760, %v3942_v7  ;;  %v228_v20 = vsub.f32 %v3879_v49, %v227_v5 }
  0x55   :  { %3082 = vmatprep.subr.bf16.mxu1 %v4791_v0  ;;  %3154 = vmatprep.subr.bf16.mxu0 %v4791_v0  ;;  %v235_v22 = vsub.f32 %v3884_v50, %v234_v6  ;;  %v3968_v27 = vsub.f32 %v3810_v21, %v155_v23  ;;  %v3977_v29 = vsub.f32 %v3824_v24, %v158_v30  ;;  %v4796_v39 = vand.u32 4294901760, %v3947_v9 }
  0x56   :  { %v110_v8 = vadd.f32 %v2131_v59, %v104_v2  ;;  %v242_v31 = vsub.f32 %v3905_v56, %v241_v11  ;;  %v249_v37 = vsub.f32 %v3910_v57, %v248_v14  ;;  %v256_v21 = vsub.f32 %v3915_v58, %v255_v15 }
  0x57   :  { %v263_v23 = vsub.f32 %v3923_v60, %v262_v16  ;;  %v3992_v24 = vpack.c.bf16 %v179_v19, %v176_v10  ;;  %v229_v30 = vand.u32 4294901760, %v228_v20  ;;  %v236_v38 = vand.u32 4294901760, %v235_v22  ;;  %v4034_v20 = vld [vmem:[#allocation7 + $0x10] sm:$0xff]  ;;  %v4046_v22 = vld [vmem:[#allocation7 + $0x18] sm:$0xff] }
  0x58   :  { %3084 = vmatpush3.bf16.msra.mxu1 %v3892_v51  ;;  %3156 = vmatpush3.bf16.msra.mxu0 %v3892_v51  ;;  %v116_v12 = vadd.f32 %v2133_v4, %v110_v8  ;;  %v4795_v41 = vand.u32 4294901760, %v3968_v27  ;;  %v4002_v42 = vsub.f32 %v3834_v26, %v161_v33  ;;  %v243_v43 = vand.u32 4294901760, %v242_v31  ;;  %v4013_v33 = vld [vmem:[#allocation7] sm:$0xff] }
  0x59   :  { %3085 = vmatprep.subr.bf16.mxu1 %v4791_v0  ;;  %3157 = vmatprep.subr.bf16.mxu0 %v4791_v0  ;;  %v250_v47 = vand.u32 4294901760, %v249_v37  ;;  %v257_v48 = vand.u32 4294901760, %v256_v21  ;;  %v264_v53 = vand.u32 4294901760, %v263_v23  ;;  %v3095_v55 = vpack.c.bf16 %v236_v38, %v229_v30  ;;  %v4050_v30 = vld [vmem:[#allocation7 + $0x20] sm:$0xff] }
  0x5a   :  { %v3972_v28 = vand.u32 4294901760, %v116_v12  ;;  %v3167_v59 = vpack.c.bf16 %v234_v6, %v227_v5  ;;  %v4010_v2 = vsub.f32 %v3947_v9, %v4796_v39  ;;  %v4790_v26 = vand.u32 4294901760, %v3977_v29 }
  0x5b   :  { %v4018_v4 = vsub.f32 %v3853_v35, %v164_v45  ;;  %v4023_v8 = vsub.f32 %v3855_v36, %v167_v46  ;;  %v4030_v6 = vsub.f32 %v3968_v27, %v4795_v41  ;;  %v4039_v35 = vsub.f32 %v3894_v52, %v170_v62  ;;  %v4052_v52 = vld [vmem:[#allocation7 + $0x28] sm:$0xff] }
  0x5c   :  { %3087 = vmatpush3.bf16.msra.mxu1 %v3929_v61  ;;  %3159 = vmatpush3.bf16.msra.mxu0 %v3929_v61  ;;  %v3981_v34 = vsub.f32 %v116_v12, %v3972_v28  ;;  %v4032_v12 = vld [vmem:[#allocation7 + $0x8] sm:$0xff]  ;;  %v4044_v36 = vsub.f32 %v3899_v54, %v173_v3  ;;  %v3170_v45 = vpack.c.bf16 %v248_v14, %v241_v11  ;;  %v290_v21 = vand.u32 4294901760, %v4002_v42  ;;  %v4060_v14 = vld [vmem:[#allocation7 + $0x30] sm:$0xff] }
  0x5d   :  { %3088 = vmatprep.subr.bf16.mxu1 %v4791_v0  ;;  %3160 = vmatprep.subr.bf16.mxu0 %v4791_v0  ;;  %v3173_v46 = vpack.c.bf16 %v262_v16, %v255_v15  ;;  %v3098_v31 = vpack.c.bf16 %v250_v47, %v243_v43  ;;  %v3101_v37 = vpack.c.bf16 %v264_v53, %v257_v48  ;;  %v4784_v23 = vand.u32 4294901760, %v4013_v33  ;;  %v4062_v15 = vld [vmem:[#allocation7 + $0x38] sm:$0xff] }
  0x5e   :  { %v216_v40 = vand.u32 4294901760, %v3981_v34  ;;  %v271_v54 = vand.u32 4294901760, %v4010_v2  ;;  %v284_v62 = vsub.f32 %v3977_v29, %v4790_v26  ;;  %v4782_v3 = vand.u32 4294901760, %v4032_v12 }
  0x5f   :  { %v4783_v11 = vand.u32 4294901760, %v4034_v20  ;;  %v278_v16 = vand.u32 4294901760, %v4030_v6  ;;  %v297_v38 = vand.u32 4294901760, %v4018_v4  ;;  %v4787_v43 = vand.u32 4294901760, %v4046_v22 }
  0x60   :  { %3090 = vmatpush3.bf16.msra.mxu1 %v3960_v18  ;;  %3162 = vmatpush3.bf16.msra.mxu0 %v3960_v18  ;;  %v217_v44 = vsub.f32 %v3981_v34, %v216_v40  ;;  %v4083_v47 = vsub.f32 %v4032_v12, %v4782_v3  ;;  %v4788_v53 = vand.u32 4294901760, %v4050_v30  ;;  %v291_v2 = vsub.f32 %v4002_v42, %v290_v21 }
  0x61   :  { %3091 = vmatprep.subr.bf16.mxu1 %v4791_v0  ;;  %3163 = vmatprep.subr.bf16.mxu0 %v4791_v0  ;;  %v4088_v48 = vsub.f32 %v4034_v20, %v4783_v11  ;;  %v4793_v6 = vand.u32 4294901760, %v4060_v14  ;;  %v4794_v3 = vand.u32 4294901760, %v4062_v15  ;;  %v304_v11 = vand.u32 4294901760, %v4023_v8 }
  0x62   :  { %v218_v5 = vand.u32 4294901760, %v217_v44  ;;  %v4074_v44 = vld [vmem:[#allocation7 + $0x40] sm:$0xff]  ;;  %v4135_v26 = vsub.f32 %v3942_v7, %v179_v19  ;;  %v298_v41 = vsub.f32 %v4018_v4, %v297_v38  ;;  %v311_v39 = vand.u32 4294901760, %v4039_v35 }
  0x63   :  { %v3104_v7 = vpack.c.bf16 %v278_v16, %v271_v54  ;;  %v4828_v19 = vand.u32 4294901760, %v3968_v27 }
  0x64   :  { %3093 = vmatpush3.bf16.msra.mxu1 %v3992_v24  ;;  %3165 = vmatpush3.bf16.msra.mxu0 %v3992_v24 }
  0x65   :  { %3094 = vmatprep.subr.bf16.mxu1 %v4791_v0  ;;  %3166 = vmatprep.subr.bf16.mxu0 %v4791_v0 }
  0x67   :  { %2473 = vmatmul.mubr.f32.vlgmr.msra.gmra.mrb[0].mxu1 %v218_v5  ;;  %2578 = vmatmul.mubr.f32.vlgmr.msra.gmra.mrb[0].mxu0 %v216_v40  ;;  %v4071_v40 = vsub.f32 %v4013_v33, %v4784_v23  ;;  %v4098_v5 = vsub.f32 %v4046_v22, %v4787_v43  ;;  %v4106_v23 = vsub.f32 %v4050_v30, %v4788_v53  ;;  %v4797_v43 = vand.u32 4294901760, %v4074_v44 }
  0x68   :  { %3096 = vmatpush3.bf16.msra.mxu1 %v3095_v55  ;;  %3168 = vmatpush3.bf16.msra.mxu0 %v3167_v59  ;;  %v4789_v55 = vand.u32 4294901760, %v4052_v52  ;;  %v4092_v59 = vld [vmem:[#allocation7 + $0x48] sm:$0xff] }
  0x69   :  { %3097 = vmatprep.subr.bf16.mxu1 %v4791_v0  ;;  %3169 = vmatprep.subr.bf16.mxu0 %v4791_v0  ;;  %v4800_v53 = vand.u32 4294901760, %v4092_v59 }
  0x6a   :  { %2507 = vmatprep.mubr.msk.f32.mxu1 %vm3660_vm0, %v4785_v1  ;;  %2612 = vmatprep.mubr.msk.f32.mxu0 %vm3660_vm0, %v4785_v1  ;;  %v4111_v1 = vsub.f32 %v4052_v52, %v4789_v55  ;;  %v4130_v55 = vsub.f32 %v3932_v63, %v176_v10  ;;  %v4827_v10 = vand.u32 4294901760, %v3947_v9 }
  0x6b   :  { %v4147_v63 = vsub.f32 %v4092_v59, %v4800_v53  ;;  %v4830_v53 = vand.u32 4294901760, %v3977_v29 }
  0x6c   :  { %3099 = vmatpush3.bf16.msra.mxu1 %v3098_v31  ;;  %3171 = vmatpush3.bf16.msra.mxu0 %v3170_v45  ;;  %4822 = vst [vmem:[#allocation15_spill] sm:$0xff] %v4111_v1  ;;  %v4119_v45 = vsub.f32 %v4060_v14, %v4793_v6  ;;  %v4124_v31 = vsub.f32 %v4062_v15, %v4794_v3  ;;  %v292_v3 = vand.u32 4294901760, %v291_v2  ;;  %v318_v2 = vand.u32 4294901760, %v4044_v36 }
  0x6d   :  { %3100 = vmatprep.subr.bf16.mxu1 %v4791_v0  ;;  %3172 = vmatprep.subr.bf16.mxu0 %v4791_v0  ;;  %v285_v0 = vand.u32 4294901760, %v284_v62  ;;  %v4140_v6 = vsub.f32 %v4074_v44, %v4797_v43  ;;  %4826 = vst [vmem:[#allocation19_spill] sm:$0xff] %v4147_v63  ;;  %v3176_v62 = vpack.c.bf16 %v4828_v19, %v4827_v10  ;;  %v325_v10 = vand.u32 4294901760, %v4130_v55 }
  0x6e   :  { %4823 = vst [vmem:[#allocation16_spill] sm:$0xff] %v4119_v45  ;;  %4824 = vst [vmem:[#allocation17_spill] sm:$0xff] %v4124_v31  ;;  %v305_v43 = vsub.f32 %v4023_v8, %v304_v11  ;;  %v3179_v63 = vpack.c.bf16 %v290_v21, %v4830_v53  ;;  %v319_v16 = vsub.f32 %v4044_v36, %v318_v2  ;;  %v332_v19 = vand.u32 4294901760, %v4135_v26 }
  0x6f   :  { %4825 = vst [vmem:[#allocation18_spill] sm:$0xff] %v4140_v6  ;;  %v4829_v6 = vmov 0.0|0.0   ;;  %v3107_v31 = vpack.c.bf16 %v292_v3, %v285_v0  ;;  %v3182_v0 = vpack.c.bf16 %v304_v11, %v297_v38  ;;  %v326_v53 = vsub.f32 %v4130_v55, %v325_v10 }
  0x70   :  { %3102 = vmatpush3.bf16.msra.mxu1 %v3101_v37  ;;  %3174 = vmatpush3.bf16.msra.mxu0 %v3173_v46  ;;  %v299_v37 = vand.u32 4294901760, %v298_v41  ;;  %v312_v46 = vsub.f32 %v4039_v35, %v311_v39  ;;  %v306_v54 = vand.u32 4294901760, %v305_v43  ;;  %v320_v21 = vand.u32 4294901760, %v319_v16 }
  0x71   :  { %3103 = vmatprep.subr.bf16.mxu1 %v4829_v6  ;;  %3175 = vmatprep.subr.bf16.mxu0 %v4829_v6  ;;  %v333_v43 = vsub.f32 %v4135_v26, %v332_v19  ;;  %v327_v45 = vand.u32 4294901760, %v326_v53  ;;  %v3188_v38 = vpack.c.bf16 %v332_v19, %v325_v10  ;;  %v907_v53 = vand.u32 4294901760, %v4098_v5 }
  0x72   :  { %v313_v3 = vand.u32 4294901760, %v312_v46  ;;  %v3110_v41 = vpack.c.bf16 %v306_v54, %v299_v37 }
  0x73   :  { %v334_v1 = vand.u32 4294901760, %v333_v43 }
  0x74   :  { %3105 = vmatpush3.bf16.msra.mxu1 %v3104_v7  ;;  %3177 = vmatpush3.bf16.msra.mxu0 %v3176_v62  ;;  %v3113_v7 = vpack.c.bf16 %v320_v21, %v313_v3  ;;  %v3185_v62 = vpack.c.bf16 %v318_v2, %v311_v39  ;;  %v4831_v39 = vmov 0.0   ;;  %v900_v21 = vand.u32 4294901760, %v4088_v48 }
  0x75   :  { %3106 = vmatprep.subr.bf16.mxu1 %v4829_v6  ;;  %3178 = vmatprep.subr.bf16.mxu0 %v4829_v6  ;;  %v3116_v11 = vpack.c.bf16 %v334_v1, %v327_v45  ;;  %v3122_v1 = vpack.c.bf16 %v3910_v57, %v3905_v56  ;;  %v4833_v56 = vand.u32 4294901760, %v4032_v12  ;;  %v893_v45 = vand.u32 4294901760, %v4083_v47 }
  0x77   :  { %v894_v37 = vsub.f32 %v4083_v47, %v893_v45 }
  0x78   :  { %3108 = vmatpush3.bf16.msra.mxu1 %v3107_v31  ;;  %3180 = vmatpush3.bf16.msra.mxu0 %v3179_v63  ;;  %v3119_v31 = vpack.c.bf16 %v3884_v50, %v3879_v49  ;;  %v3125_v49 = vpack.c.bf16 %v3923_v60, %v3915_v58  ;;  %v3140_v50 = vpack.c.bf16 %v4135_v26, %v4130_v55  ;;  %v4834_v58 = vand.u32 4294901760, %v4034_v20 }
  0x79   :  { %3109 = vmatprep.subr.bf16.mxu1 %v4829_v6  ;;  %3181 = vmatprep.subr.bf16.mxu0 %v4829_v6  ;;  %v4835_v60 = vand.u32 4294901760, %v4046_v22 }
  0x7c   :  { %3111 = vmatpush3.bf16.msra.mxu1 %v3110_v41  ;;  %3183 = vmatpush3.bf16.msra.mxu0 %v3182_v0  ;;  %v895_v41 = vand.u32 4294901760, %v894_v37 }
  0x7d   :  { %3112 = vmatprep.subr.bf16.mxu1 %v4829_v6  ;;  %3184 = vmatprep.subr.bf16.mxu0 %v4829_v6 }
  0x80   :  { %3114 = vmatpush3.bf16.msra.mxu1 %v3113_v7  ;;  %3186 = vmatpush3.bf16.msra.mxu0 %v3185_v62  ;;  %v901_v7 = vsub.f32 %v4088_v48, %v900_v21  ;;  %v908_v62 = vsub.f32 %v4098_v5, %v907_v53 }
  0x81   :  { %3115 = vmatprep.subr.bf16.mxu1 %v4829_v6  ;;  %3187 = vmatprep.subr.bf16.mxu0 %v4829_v6 }
  0x84   :  { %3117 = vmatpush3.bf16.msra.mxu1 %v3116_v11  ;;  %3189 = vmatpush3.bf16.msra.mxu0 %v3188_v38  ;;  %v4815_v11 = vand.u32 4294901760, %v4106_v23  ;;  %v4842_v38 = vld [vmem:[#allocation15_spill] sm:$0xff] }
  0x85   :  { %3118 = vmatprep.subr.bf16.mxu1 %v4829_v6  ;;  %3190 = vmatprep.subr.bf16.mxu0 %v4829_v6 }
  0x87   :  { %2508 = vmatmul.mubr.f32.vlgmr.msra.gmra.mrb[0].mxu1 %v3972_v28  ;;  %2613 = vmatmul.mubr.f32.vlgmr.msra.gmra.mrb[0].mxu0 %v3972_v28 }
  0x88   :  { %3120 = vmatpush3.bf16.msra.mxu1 %v3119_v31  ;;  %3192 = vmatpush3.bf16.msra.mxu0 %v3790_v13  ;;  %v3128_v13 = vpack.c.bf16 %v3968_v27, %v3947_v9  ;;  %v4836_v9 = vand.u32 4294901760, %v4050_v30  ;;  %v4814_v31 = vand.u32 4294901760, %v4842_v38 }
  0x89   :  { %3121 = vmatprep.subr.bf16.mxu1 %v4829_v6  ;;  %3193 = vmatprep.subr.bf16.mxu0 %v4829_v6 }
  0x8a   :  { %2542 = vmatprep.mubr.msk.f32.mxu1 %vm3660_vm0, %v4831_v39  ;;  %2647 = vmatprep.mubr.msk.f32.mxu0 %vm3660_vm0, %v4831_v39 }
  0x8c   :  { %3123 = vmatpush3.bf16.msra.mxu1 %v3122_v1  ;;  %3195 = vmatpush3.bf16.msra.mxu0 %v3804_v17  ;;  %v3131_v17 = vpack.c.bf16 %v4002_v42, %v3977_v29  ;;  %v4839_v29 = vand.u32 4294901760, %v4062_v15  ;;  %v4841_v42 = vand.u32 4294901760, %v4092_v59  ;;  %v790_v15 = vld [vmem:[#allocation7 + $0x78] sm:$0xff]  ;;  %v886_v59 = vand.u32 4294901760, %v4071_v40 }
  0x8d   :  { %3124 = vmatprep.subr.bf16.mxu1 %v4829_v6  ;;  %3196 = vmatprep.subr.bf16.mxu0 %v4829_v6  ;;  %v838_v55 = vand.u32 4294901760, %v790_v15  ;;  %v902_v1 = vand.u32 4294901760, %v901_v7 }
  0x8e   :  { %v887_v2 = vsub.f32 %v4071_v40, %v886_v59 }
  0x8f   :  { %v4296_v0 = vsub.f32 %v790_v15, %v838_v55 }
  0x90   :  { %3126 = vmatpush3.bf16.msra.mxu1 %v3125_v49  ;;  %3198 = vmatpush3.bf16.msra.mxu0 %v3832_v25  ;;  %v3134_v25 = vpack.c.bf16 %v4023_v8, %v4018_v4  ;;  %v786_v4 = vld [vmem:[#allocation7 + $0x58] sm:$0xff]  ;;  %v888_v3 = vand.u32 4294901760, %v887_v2  ;;  %v909_v49 = vand.u32 4294901760, %v908_v62 }
  0x91   :  { %3127 = vmatprep.subr.bf16.mxu1 %v4829_v6  ;;  %3199 = vmatprep.subr.bf16.mxu0 %v4829_v6  ;;  %v826_v12 = vand.u32 4294901760, %v786_v4 }
  0x92   :  { %v4301_v43 = vpack.c.bf16 %v895_v41, %v888_v3 }
  0x93   :  { %v4287_v54 = vsub.f32 %v786_v4, %v826_v12  ;;  %v4846_v4 = vld [vmem:[#allocation19_spill] sm:$0xff] }
  0x94   :  { %3129 = vmatpush3.bf16.msra.mxu1 %v3128_v13  ;;  %3201 = vmatpush3.bf16.msra.mxu0 %v3846_v32  ;;  %v3137_v32 = vpack.c.bf16 %v4044_v36, %v4039_v35  ;;  %v787_v35 = vld [vmem:[#allocation7 + $0x60] sm:$0xff]  ;;  %v788_v36 = vld [vmem:[#allocation7 + $0x68] sm:$0xff]  ;;  %v915_v13 = vsub.f32 %v4106_v23, %v4815_v11 }
  0x95   :  { %3130 = vmatprep.subr.bf16.mxu1 %v4829_v6  ;;  %3202 = vmatprep.subr.bf16.mxu0 %v4829_v6  ;;  %v829_v22 = vand.u32 4294901760, %v787_v35  ;;  %v832_v30 = vand.u32 4294901760, %v788_v36  ;;  %v4808_v15 = vand.u32 4294901760, %v4287_v54 }
  0x97   :  { %v4289_v16 = vsub.f32 %v787_v35, %v829_v22  ;;  %v4291_v10 = vsub.f32 %v788_v36, %v832_v30  ;;  %v964_v2 = vsub.f32 %v4287_v54, %v4808_v15 }
  0x98   :  { %3132 = vmatpush3.bf16.msra.mxu1 %v3131_v17  ;;  %3204 = vmatpush3.bf16.msra.mxu0 %v3892_v51  ;;  %v4832_v51 = vand.u32 4294901760, %v4013_v33  ;;  %v785_v33 = vld [vmem:[#allocation7 + $0x50] sm:$0xff]  ;;  %v922_v17 = vsub.f32 %v4842_v38, %v4814_v31 }
  0x99   :  { %3133 = vmatprep.subr.bf16.mxu1 %v4829_v6  ;;  %3205 = vmatprep.subr.bf16.mxu0 %v4829_v6  ;;  %v823_v8 = vand.u32 4294901760, %v785_v33  ;;  %v965_v3 = vand.u32 4294901760, %v964_v2  ;;  %v4807_v41 = vand.u32 4294901760, %v4289_v16  ;;  %v4806_v7 = vand.u32 4294901760, %v4291_v10 }
  0x9a   :  { %v4223_v57 = vpack.c.bf16 %v4833_v56, %v4832_v51  ;;  %v4843_v51 = vld [vmem:[#allocation16_spill] sm:$0xff] }
  0x9b   :  { %v4267_v20 = vpack.c.bf16 %v826_v12, %v823_v8  ;;  %v4285_v46 = vsub.f32 %v785_v33, %v823_v8  ;;  %v4813_v56 = vand.u32 4294901760, %v4843_v51  ;;  %v4810_v8 = vand.u32 4294901760, %v4846_v4 }
  0x9c   :  { %3135 = vmatpush3.bf16.msra.mxu1 %v3134_v25  ;;  %3207 = vmatpush3.bf16.msra.mxu0 %v3929_v61  ;;  %v4234_v61 = vpack.c.bf16 %v4835_v60, %v4834_v58  ;;  %v3242_v25 = vpack.c.bf16 %v909_v49, %v902_v1  ;;  %v4844_v58 = vld [vmem:[#allocation17_spill] sm:$0xff]  ;;  %v971_v1 = vsub.f32 %v4289_v16, %v4807_v41 }
  0x9d   :  { %3136 = vmatprep.subr.bf16.mxu1 %v4829_v6  ;;  %3208 = vmatprep.subr.bf16.mxu0 %v4829_v6  ;;  %v4812_v60 = vand.u32 4294901760, %v4844_v58  ;;  %v950_v36 = vsub.f32 %v4846_v4, %v4810_v8  ;;  %v978_v49 = vsub.f32 %v4291_v10, %v4806_v7  ;;  %v3272_v2 = vpack.c.bf16 %v4844_v58, %v4843_v51 }
  0xa0   :  { %3138 = vmatpush3.bf16.msra.mxu1 %v3137_v32  ;;  %3210 = vmatpush3.bf16.msra.mxu0 %v3960_v18  ;;  %v4837_v18 = vand.u32 4294901760, %v4052_v52  ;;  %v4271_v52 = vpack.c.bf16 %v832_v30, %v829_v22  ;;  %v916_v32 = vand.u32 4294901760, %v915_v13  ;;  %v951_v30 = vand.u32 4294901760, %v950_v36 }
  0xa1   :  { %3139 = vmatprep.subr.bf16.mxu1 %v4829_v6  ;;  %3211 = vmatprep.subr.bf16.mxu0 %v4829_v6  ;;  %v972_v13 = vand.u32 4294901760, %v971_v1  ;;  %v3281_v1 = vpack.c.bf16 %v4291_v10, %v4289_v16 }
  0xa2   :  { %v4246_v27 = vpack.c.bf16 %v4837_v18, %v4836_v9  ;;  %v929_v18 = vsub.f32 %v4843_v51, %v4813_v56 }
  0xa4   :  { %3141 = vmatpush3.bf16.msra.mxu1 %v3140_v50  ;;  %3213 = vmatpush3.bf16.msra.mxu0 %v3992_v24  ;;  %v4840_v24 = vand.u32 4294901760, %v4074_v44  ;;  %v923_v50 = vand.u32 4294901760, %v922_v17  ;;  %v979_v17 = vand.u32 4294901760, %v978_v49 }
  0xa5   :  { %3214 = vmatprep.subr.bf16.mxu1 %v4829_v6  ;;  %3358 = vmatprep.subr.bf16.mxu0 %v4829_v6 }
  0xa6   :  { %v4262_v26 = vpack.c.bf16 %v4841_v42, %v4840_v24  ;;  %v3245_v9 = vpack.c.bf16 %v923_v50, %v916_v32  ;;  %v4845_v42 = vld [vmem:[#allocation18_spill] sm:$0xff]  ;;  %v4804_v50 = vand.u32 4294901760, %v4296_v0 }
  0xa7   :  { %2543 = vmatmul.mubr.f32.vlgmr.msra.gmra.mrb[0].mxu1 %v3981_v34  ;;  %2648 = vmatmul.mubr.f32.vlgmr.msra.gmra.mrb[0].mxu0 %v3972_v28  ;;  %v4838_v28 = vand.u32 4294901760, %v4060_v14  ;;  %v789_v14 = vld [vmem:[#allocation7 + $0x70] sm:$0xff]  ;;  %v4811_v33 = vand.u32 4294901760, %v4845_v42 }
  0xa8   :  { %3216 = vmatpush3.bf16.msra.mxu1 %v4223_v57  ;;  %2682 = vmatprep.mubr.msk.f32.mxu1 %vm3660_vm0, %v4831_v39  ;;  %v835_v44 = vand.u32 4294901760, %v789_v14 }
  0xa9   :  { %3217 = vmatprep.subr.bf16.mxu1 %v4829_v6  ;;  %2892 = vmatprep.mubr.msk.f32.mxu0 %vm3660_vm0, %v4831_v39  ;;  %v4254_v34 = vpack.c.bf16 %v4839_v29, %v4838_v28  ;;  %v936_v28 = vsub.f32 %v4844_v58, %v4812_v60  ;;  %v930_v29 = vand.u32 4294901760, %v929_v18  ;;  %v943_v35 = vsub.f32 %v4845_v42, %v4811_v33  ;;  %v1443_v33 = vld [vmem:[#allocation9 + $0x48] sm:$0xff] }
  0xaa   :  { %v4277_v63 = vpack.c.bf16 %v838_v55, %v835_v44  ;;  %v4294_v19 = vsub.f32 %v789_v14, %v835_v44  ;;  %v4809_v14 = vand.u32 4294901760, %v4285_v46  ;;  %v3257_v18 = vpack.c.bf16 %v979_v17, %v972_v13 }
  0xab   :  { %v937_v24 = vand.u32 4294901760, %v936_v28  ;;  %v944_v22 = vand.u32 4294901760, %v943_v35 }
  0xac   :  { %3219 = vmatpush3.bf16.msra.mxu1 %v4234_v61  ;;  %v957_v55 = vsub.f32 %v4285_v46, %v4809_v14  ;;  %v4805_v32 = vand.u32 4294901760, %v4294_v19  ;;  %v3284_v49 = vpack.c.bf16 %v4296_v0, %v4294_v19 }
  0xad   :  { %3220 = vmatprep.subr.bf16.mxu1 %v4829_v6  ;;  %v3248_v12 = vpack.c.bf16 %v937_v24, %v930_v29  ;;  %v3251_v44 = vpack.c.bf16 %v951_v30, %v944_v22  ;;  %v992_v29 = vsub.f32 %v4296_v0, %v4804_v50  ;;  %v3263_v22 = vpack.c.bf16 %v4083_v47, %v4071_v40 }
  0xae   :  { %v958_v37 = vand.u32 4294901760, %v957_v55  ;;  %v985_v28 = vsub.f32 %v4294_v19, %v4805_v32  ;;  %v3266_v30 = vpack.c.bf16 %v4098_v5, %v4088_v48  ;;  %v3269_v55 = vpack.c.bf16 %v4842_v38, %v4106_v23 }
  0xaf   :  { %v993_v35 = vand.u32 4294901760, %v992_v29  ;;  %v4847_v40 = vand.u32 4294901760, %v4106_v23  ;;  %v4848_v47 = vand.u32 4294901760, %v4842_v38  ;;  %v4850_v48 = vand.u32 4294901760, %v4844_v58 }
  0xb0   :  { %3222 = vmatpush3.bf16.msra.mxu1 %v4246_v27  ;;  %v3254_v62 = vpack.c.bf16 %v965_v3, %v958_v37  ;;  %v986_v24 = vand.u32 4294901760, %v985_v28  ;;  %v3275_v37 = vpack.c.bf16 %v4846_v4, %v4845_v42  ;;  %v3278_v3 = vpack.c.bf16 %v4287_v54, %v4285_v46 }
  0xb1   :  { %3223 = vmatprep.subr.bf16.mxu1 %v4829_v6  ;;  %v4853_v23 = vand.u32 4294901760, %v4285_v46  ;;  %v4854_v38 = vand.u32 4294901760, %v4287_v54  ;;  %v4856_v58 = vand.u32 4294901760, %v4291_v10  ;;  %v1447_v54 = vld [vmem:[#allocation9 + $0x68] sm:$0xff]  ;;  %v1448_v10 = vld [vmem:[#allocation9 + $0x70] sm:$0xff] }
  0xb2   :  { %v3260_v36 = vpack.c.bf16 %v993_v35, %v986_v24 }
  0xb4   :  { %3225 = vmatpush3.bf16.msra.mxu1 %v4254_v34 }
  0xb5   :  { %3226 = vmatprep.subr.bf16.mxu1 %v4829_v6 }
  0xb8   :  { %3228 = vmatpush3.bf16.msra.mxu1 %v4262_v26 }
  0xb9   :  { %3229 = vmatprep.subr.bf16.mxu1 %v4829_v6 }
  0xbc   :  { %3231 = vmatpush3.bf16.msra.mxu1 %v4267_v20 }
  0xbd   :  { %3232 = vmatprep.subr.bf16.mxu1 %v4829_v6 }
  0xc0   :  { %3234 = vmatpush3.bf16.msra.mxu1 %v4271_v52 }
  0xc1   :  { %3235 = vmatprep.subr.bf16.mxu1 %v4829_v6 }
  0xc4   :  { %3237 = vmatpush3.bf16.msra.mxu1 %v4277_v63 }
  0xc5   :  { %3238 = vmatprep.subr.bf16.mxu1 %v4829_v6 }
 0x17a   :  { %v475_v13 = vpop.f32.mrb[0].mxu1  ;;  %v770_v17 = vpop.f32.mrb[0].mxu0 }
 0x17b   :  { %v3502_v28 = vadd.f32 %v770_v17, %v475_v13  ;;  %v2544_v29 = vpop.f32.mrb[1].mxu1  ;;  %v2649_v24 = vpop.f32.mrb[1].mxu0 }
 0x17c   :  { %v1441_v29 = vld [vmem:[#allocation9 + $0x38] sm:$0xff]  ;;  %v1442_v24 = vld [vmem:[#allocation9 + $0x40] sm:$0xff] }
 0x17d   :  { %v774_v35 = vmul.f32 0.125, %v3502_v28  ;;  %v1440_v28 = vld [vmem:[#allocation9 + $0x30] sm:$0xff] }
 0x17f   :  { %v4373_v50 = vand.u32 4294901760, %v774_v35 }
 0x181   :  { %v4376_v32 = vsub.f32 %v774_v35, %v4373_v50 }
 0x183   :  { %v875_v7 = vand.u32 4294901760, %v4376_v32 }
 0x185   :  { %v876_v41 = vsub.f32 %v4376_v32, %v875_v7 }
 0x187   :  { %v877_v15 = vand.u32 4294901760, %v876_v41 }
 0x189   :  { %2683 = vmatmul.mubr.f32.vlgmr.msra.gmra.mrb[2].mxu1 %v877_v15 }
 0x18a   :  { %3240 = vmatpush3.bf16.msra.mxu1 %v4301_v43  ;;  %2717 = vmatprep.mubr.msk.f32.mxu1 %vm3660_vm0, %v4831_v39  ;;  %v1434_v43 = vld [vmem:[#allocation9] sm:$0xff] }
 0x18b   :  { %3241 = vmatprep.subr.bf16.mxu1 %v4829_v6 }
 0x18e   :  { %3243 = vmatpush3.bf16.msra.mxu1 %v3242_v25  ;;  %v1435_v25 = vld [vmem:[#allocation9 + $0x8] sm:$0xff] }
 0x18f   :  { %3244 = vmatprep.subr.bf16.mxu1 %v4829_v6  ;;  %v1455_v15 = vand.u32 4294901760, %v1435_v25 }
 0x191   :  { %v4401_v14 = vsub.f32 %v1435_v25, %v1455_v15  ;;  %v1473_v25 = vand.u32 4294901760, %v1441_v29 }
 0x192   :  { %3246 = vmatpush3.bf16.msra.mxu1 %v3245_v9  ;;  %v1436_v9 = vld [vmem:[#allocation9 + $0x10] sm:$0xff] }
 0x193   :  { %3247 = vmatprep.subr.bf16.mxu1 %v4829_v6  ;;  %v1458_v41 = vand.u32 4294901760, %v1436_v9 }
 0x195   :  { %v4403_v8 = vsub.f32 %v1436_v9, %v1458_v41  ;;  %v1479_v9 = vand.u32 4294901760, %v1443_v33 }
 0x196   :  { %3249 = vmatpush3.bf16.msra.mxu1 %v3248_v12  ;;  %v1452_v12 = vand.u32 4294901760, %v1434_v43 }
 0x197   :  { %3250 = vmatprep.subr.bf16.mxu1 %v4829_v6 }
 0x198   :  { %v4397_v35 = vpack.c.bf16 %v1455_v15, %v1452_v12 }
 0x19a   :  { %3252 = vmatpush3.bf16.msra.mxu1 %v3251_v44  ;;  %v1437_v44 = vld [vmem:[#allocation9 + $0x18] sm:$0xff]  ;;  %3360 = vmatpush3.bf16.msra.mxu0 %v4397_v35 }
 0x19b   :  { %3253 = vmatprep.subr.bf16.mxu1 %v4829_v6  ;;  %3361 = vmatprep.subr.bf16.mxu0 %v4829_v6 }
 0x19e   :  { %3255 = vmatpush3.bf16.msra.mxu1 %v3254_v62  ;;  %v1438_v62 = vld [vmem:[#allocation9 + $0x20] sm:$0xff] }
 0x19f   :  { %3256 = vmatprep.subr.bf16.mxu1 %v4829_v6  ;;  %v1464_v13 = vand.u32 4294901760, %v1438_v62 }
 0x1a1   :  { %v4409_v31 = vsub.f32 %v1438_v62, %v1464_v13  ;;  %v4425_v62 = vsub.f32 %v1443_v33, %v1479_v9 }
 0x1a2   :  { %3258 = vmatpush3.bf16.msra.mxu1 %v3257_v18  ;;  %v1439_v18 = vld [vmem:[#allocation9 + $0x28] sm:$0xff] }
 0x1a3   :  { %3259 = vmatprep.subr.bf16.mxu1 %v4829_v6  ;;  %v1467_v17 = vand.u32 4294901760, %v1439_v18 }
 0x1a5   :  { %v4415_v11 = vsub.f32 %v1439_v18, %v1467_v17 }
 0x1a6   :  { %3261 = vmatpush3.bf16.msra.mxu1 %v3260_v36  ;;  %v1461_v36 = vand.u32 4294901760, %v1437_v44 }
 0x1a7   :  { %3262 = vmatprep.subr.bf16.mxu1 %v4829_v6 }
 0x1a8   :  { %v4405_v60 = vpack.c.bf16 %v1461_v36, %v1458_v41  ;;  %v4407_v56 = vsub.f32 %v1437_v44, %v1461_v36  ;;  %v4421_v44 = vsub.f32 %v1441_v29, %v1473_v25 }
 0x1a9   :  { %2718 = vmatmul.mubr.f32.vlgmr.msra.gmra.mrb[2].mxu1 %v4373_v50 }
 0x1aa   :  { %3264 = vmatpush3.bf16.msra.mxu1 %v3263_v22  ;;  %2752 = vmatprep.mubr.msk.f32.mxu1 %vm3660_vm0, %v4831_v39  ;;  %v4399_v22 = vsub.f32 %v1434_v43, %v1452_v12  ;;  %v1470_v43 = vand.u32 4294901760, %v1440_v28  ;;  %v1476_v12 = vand.u32 4294901760, %v1442_v24 }
 0x1ab   :  { %3265 = vmatprep.subr.bf16.mxu1 %v4829_v6  ;;  %3363 = vmatpush3.bf16.msra.mxu0 %v4405_v60 }
 0x1ac   :  { %v4419_v15 = vsub.f32 %v1440_v28, %v1470_v43  ;;  %v4423_v41 = vsub.f32 %v1442_v24, %v1476_v12  ;;  %3364 = vmatprep.subr.bf16.mxu0 %v4829_v6  ;;  %v4439_v33 = vpack.c.bf16 %v1473_v25, %v1470_v43 }
 0x1ae   :  { %3267 = vmatpush3.bf16.msra.mxu1 %v3266_v30  ;;  %v4431_v30 = vpack.c.bf16 %v1467_v17, %v1464_v13 }
 0x1af   :  { %3268 = vmatprep.subr.bf16.mxu1 %v4829_v6 }
 0x1b0   :  { %3366 = vmatpush3.bf16.msra.mxu0 %v4431_v30 }
 0x1b1   :  { %3367 = vmatprep.subr.bf16.mxu0 %v4829_v6 }
 0x1b2   :  { %3270 = vmatpush3.bf16.msra.mxu1 %v3269_v55  ;;  %v4447_v55 = vpack.c.bf16 %v1479_v9, %v1476_v12 }
 0x1b3   :  { %3271 = vmatprep.subr.bf16.mxu1 %v4829_v6 }
 0x1b4   :  { %3369 = vmatpush3.bf16.msra.mxu0 %v4439_v33 }
 0x1b5   :  { %3370 = vmatprep.subr.bf16.mxu0 %v4829_v6 }
 0x1b6   :  { %3273 = vmatpush3.bf16.msra.mxu1 %v3272_v2  ;;  %v3311_v2 = vpack.c.bf16 %v893_v45, %v886_v59  ;;  %v3317_v59 = vpack.c.bf16 %v4848_v47, %v4847_v40  ;;  %v4849_v45 = vand.u32 4294901760, %v4843_v51  ;;  %v4855_v51 = vand.u32 4294901760, %v4289_v16 }
 0x1b7   :  { %3274 = vmatprep.subr.bf16.mxu1 %v4829_v6  ;;  %v1491_v16 = vand.u32 4294901760, %v1447_v54 }
 0x1b8   :  { %3372 = vmatpush3.bf16.msra.mxu0 %v4447_v55  ;;  %v3320_v5 = vpack.c.bf16 %v4850_v48, %v4849_v45  ;;  %v1573_v45 = vand.u32 4294901760, %v4409_v31  ;;  %v1580_v48 = vand.u32 4294901760, %v4415_v11 }
 0x1b9   :  { %3373 = vmatprep.subr.bf16.mxu0 %v4829_v6  ;;  %v4571_v24 = vsub.f32 %v1447_v54, %v1491_v16 }
 0x1ba   :  { %3276 = vmatpush3.bf16.msra.mxu1 %v3275_v37  ;;  %v3314_v37 = vpack.c.bf16 %v907_v53, %v900_v21  ;;  %v4851_v21 = vand.u32 4294901760, %v4845_v42  ;;  %v4852_v53 = vand.u32 4294901760, %v4846_v4  ;;  %v4857_v42 = vand.u32 4294901760, %v4294_v19 }
 0x1bb   :  { %3277 = vmatprep.subr.bf16.mxu1 %v4829_v6  ;;  %v4858_v4 = vand.u32 4294901760, %v4296_v0  ;;  %v1494_v19 = vand.u32 4294901760, %v1448_v10 }
 0x1bd   :  { %v4574_v43 = vsub.f32 %v1448_v10, %v1494_v19 }
 0x1be   :  { %3279 = vmatpush3.bf16.msra.mxu1 %v3278_v3  ;;  %v3329_v3 = vpack.c.bf16 %v4856_v58, %v4855_v51  ;;  %v1587_v51 = vand.u32 4294901760, %v4419_v15  ;;  %v1594_v58 = vand.u32 4294901760, %v4421_v44 }
 0x1bf   :  { %3280 = vmatprep.subr.bf16.mxu1 %v4829_v6 }
 0x1c2   :  { %3282 = vmatpush3.bf16.msra.mxu1 %v3281_v1  ;;  %v3332_v1 = vpack.c.bf16 %v4858_v4, %v4857_v42  ;;  %v1588_v42 = vsub.f32 %v4419_v15, %v1587_v51  ;;  %v1595_v4 = vsub.f32 %v4421_v44, %v1594_v58 }
 0x1c3   :  { %3283 = vmatprep.subr.bf16.mxu1 %v4829_v6 }
 0x1c6   :  { %3285 = vmatpush3.bf16.msra.mxu1 %v3284_v49  ;;  %v1552_v49 = vand.u32 4294901760, %v4401_v14 }
 0x1c7   :  { %3286 = vmatprep.subr.bf16.mxu1 %v4829_v6 }
 0x1c8   :  { %v1553_v13 = vsub.f32 %v4401_v14, %v1552_v49 }
 0x1c9   :  { %2753 = vmatmul.mubr.f32.vlgmr.msra.gmra.mrb[2].mxu1 %v4376_v32  ;;  %v3326_v32 = vpack.c.bf16 %v4854_v38, %v4853_v23 }
 0x1ca   :  { %3288 = vmatpush3.bf16.msra.mxu1 %v4223_v57  ;;  %2787 = vmatprep.mubr.msk.f32.mxu1 %vm3660_vm0, %v4831_v39  ;;  %v1554_v9 = vand.u32 4294901760, %v1553_v13 }
 0x1cb   :  { %3289 = vmatprep.subr.bf16.mxu1 %v4829_v6 }
 0x1ce   :  { %3291 = vmatpush3.bf16.msra.mxu1 %v4234_v61 }
 0x1cf   :  { %3292 = vmatprep.subr.bf16.mxu1 %v4829_v6 }
 0x1d2   :  { %3294 = vmatpush3.bf16.msra.mxu1 %v4246_v27 }
 0x1d3   :  { %3295 = vmatprep.subr.bf16.mxu1 %v4829_v6 }
 0x1d6   :  { %3297 = vmatpush3.bf16.msra.mxu1 %v4254_v34 }
 0x1d7   :  { %3298 = vmatprep.subr.bf16.mxu1 %v4829_v6 }
 0x1da   :  { %3300 = vmatpush3.bf16.msra.mxu1 %v4262_v26 }
 0x1db   :  { %3301 = vmatprep.subr.bf16.mxu1 %v4829_v6 }
 0x1de   :  { %3303 = vmatpush3.bf16.msra.mxu1 %v4267_v20 }
 0x1df   :  { %3304 = vmatprep.subr.bf16.mxu1 %v4829_v6 }
 0x1e2   :  { %3306 = vmatpush3.bf16.msra.mxu1 %v4271_v52 }
 0x1e3   :  { %3307 = vmatprep.subr.bf16.mxu1 %v4829_v6 }
 0x1e6   :  { %3309 = vmatpush3.bf16.msra.mxu1 %v4277_v63 }
 0x1e7   :  { %3310 = vmatprep.subr.bf16.mxu1 %v4829_v6 }
 0x1e9   :  { %2788 = vmatmul.mubr.f32.vlgmr.msra.gmra.mrb[2].mxu1 %v875_v7  ;;  %v3323_v7 = vpack.c.bf16 %v4852_v53, %v4851_v21  ;;  %v1574_v53 = vsub.f32 %v4409_v31, %v1573_v45 }
 0x1ea   :  { %3312 = vmatpush3.bf16.msra.mxu1 %v3311_v2  ;;  %2822 = vmatprep.mubr.msk.f32.mxu1 %vm3660_vm0, %v4831_v39  ;;  %v1559_v2 = vand.u32 4294901760, %v4403_v8 }
 0x1eb   :  { %3313 = vmatprep.subr.bf16.mxu1 %v4829_v6  ;;  %v1575_v38 = vand.u32 4294901760, %v1574_v53 }
 0x1ec   :  { %v1560_v47 = vsub.f32 %v4403_v8, %v1559_v2 }
 0x1ee   :  { %3315 = vmatpush3.bf16.msra.mxu1 %v3314_v37  ;;  %v1566_v37 = vand.u32 4294901760, %v4407_v56 }
 0x1ef   :  { %3316 = vmatprep.subr.bf16.mxu1 %v4829_v6 }
 0x1f2   :  { %3318 = vmatpush3.bf16.msra.mxu1 %v3317_v59  ;;  %v1567_v59 = vsub.f32 %v4407_v56, %v1566_v37 }
 0x1f3   :  { %3319 = vmatprep.subr.bf16.mxu1 %v4829_v6 }
 0x1f4   :  { %v1568_v21 = vand.u32 4294901760, %v1567_v59 }
 0x1f6   :  { %3321 = vmatpush3.bf16.msra.mxu1 %v3320_v5  ;;  %v1561_v5 = vand.u32 4294901760, %v1560_v47  ;;  %v4818_v47 = vand.u32 4294901760, %v4571_v24 }
 0x1f7   :  { %3322 = vmatprep.subr.bf16.mxu1 %v4829_v6 }
 0x1f8   :  { %v3386_v23 = vpack.c.bf16 %v1568_v21, %v1561_v5  ;;  %v1637_v21 = vsub.f32 %v4571_v24, %v4818_v47 }
 0x1fa   :  { %3324 = vmatpush3.bf16.msra.mxu1 %v3323_v7  ;;  %v1581_v7 = vsub.f32 %v4415_v11, %v1580_v48 }
 0x1fb   :  { %3325 = vmatprep.subr.bf16.mxu1 %v4829_v6 }
 0x1fe   :  { %3327 = vmatpush3.bf16.msra.mxu1 %v3326_v32  ;;  %v1582_v32 = vand.u32 4294901760, %v1581_v7  ;;  %v1638_v7 = vand.u32 4294901760, %v1637_v21 }
 0x1ff   :  { %3328 = vmatprep.subr.bf16.mxu1 %v4829_v6 }
 0x202   :  { %3330 = vmatpush3.bf16.msra.mxu1 %v3329_v3  ;;  %v3389_v3 = vpack.c.bf16 %v1582_v32, %v1575_v38  ;;  %v4817_v38 = vand.u32 4294901760, %v4574_v43 }
 0x203   :  { %3331 = vmatprep.subr.bf16.mxu1 %v4829_v6 }
 0x206   :  { %3333 = vmatpush3.bf16.msra.mxu1 %v3332_v1  ;;  %v1589_v1 = vand.u32 4294901760, %v1588_v42 }
 0x207   :  { %3334 = vmatprep.subr.bf16.mxu1 %v4829_v6 }
 0x209   :  { %2823 = vmatmul.mubr.f32.vlgmr.msra.gmra.mrb[2].mxu1 %v4373_v50 }
 0x20a   :  { %3336 = vmatpush3.bf16.msra.mxu1 %v4223_v57  ;;  %2857 = vmatprep.mubr.msk.f32.mxu1 %vm3660_vm0, %v4831_v39  ;;  %v1444_v57 = vld [vmem:[#allocation9 + $0x50] sm:$0xff] }
 0x20b   :  { %3337 = vmatprep.subr.bf16.mxu1 %v4829_v6 }
 0x20e   :  { %3339 = vmatpush3.bf16.msra.mxu1 %v4234_v61  ;;  %v1445_v61 = vld [vmem:[#allocation9 + $0x58] sm:$0xff] }
 0x20f   :  { %3340 = vmatprep.subr.bf16.mxu1 %v4829_v6 }
 0x212   :  { %3342 = vmatpush3.bf16.msra.mxu1 %v4246_v27  ;;  %v1482_v27 = vand.u32 4294901760, %v1444_v57 }
 0x213   :  { %3343 = vmatprep.subr.bf16.mxu1 %v4829_v6 }
 0x214   :  { %v4565_v17 = vsub.f32 %v1444_v57, %v1482_v27  ;;  %v1596_v57 = vand.u32 4294901760, %v1595_v4  ;;  %v1644_v4 = vsub.f32 %v4574_v43, %v4817_v38 }
 0x216   :  { %3345 = vmatpush3.bf16.msra.mxu1 %v4254_v34  ;;  %v1485_v34 = vand.u32 4294901760, %v1445_v61  ;;  %v1615_v10 = vand.u32 4294901760, %v4565_v17 }
 0x217   :  { %3346 = vmatprep.subr.bf16.mxu1 %v4829_v6 }
 0x218   :  { %v4547_v46 = vpack.c.bf16 %v1485_v34, %v1482_v27  ;;  %v4567_v28 = vsub.f32 %v1445_v61, %v1485_v34  ;;  %v1601_v61 = vand.u32 4294901760, %v4423_v41  ;;  %v1608_v27 = vand.u32 4294901760, %v4425_v62 }
 0x219   :  { %v3392_v34 = vpack.c.bf16 %v1596_v57, %v1589_v1  ;;  %v1645_v57 = vand.u32 4294901760, %v1644_v4 }
 0x21a   :  { %3348 = vmatpush3.bf16.msra.mxu1 %v4262_v26  ;;  %v1446_v26 = vld [vmem:[#allocation9 + $0x60] sm:$0xff]  ;;  %3375 = vmatpush3.bf16.msra.mxu0 %v4547_v46  ;;  %v1609_v54 = vsub.f32 %v4425_v62, %v1608_v27 }
 0x21b   :  { %3349 = vmatprep.subr.bf16.mxu1 %v4829_v6  ;;  %3376 = vmatprep.subr.bf16.mxu0 %v4829_v6 }
 0x21e   :  { %3351 = vmatpush3.bf16.msra.mxu1 %v4267_v20  ;;  %v1488_v20 = vand.u32 4294901760, %v1446_v26 }
 0x21f   :  { %3352 = vmatprep.subr.bf16.mxu1 %v4829_v6 }
 0x220   :  { %v4569_v29 = vsub.f32 %v1446_v26, %v1488_v20  ;;  %v1602_v26 = vsub.f32 %v4423_v41, %v1601_v61 }
 0x222   :  { %3354 = vmatpush3.bf16.msra.mxu1 %v4271_v52  ;;  %v4551_v52 = vpack.c.bf16 %v1491_v16, %v1488_v20  ;;  %v1603_v20 = vand.u32 4294901760, %v1602_v26  ;;  %v1610_v16 = vand.u32 4294901760, %v1609_v54 }
 0x223   :  { %3355 = vmatprep.subr.bf16.mxu1 %v4829_v6 }
 0x224   :  { %3378 = vmatpush3.bf16.msra.mxu0 %v4551_v52 }
 0x225   :  { %3379 = vmatprep.subr.bf16.mxu0 %v4829_v6 }
 0x226   :  { %3357 = vmatpush3.bf16.msra.mxu1 %v4277_v63  ;;  %v1449_v63 = vld [vmem:[#allocation9 + $0x78] sm:$0xff] }
 0x227   :  { %v1497_v0 = vand.u32 4294901760, %v1449_v63 }
 0x229   :  { %2858 = vmatmul.mubr.f32.vlgmr.msra.gmra.mrb[2].mxu1 %v4373_v50  ;;  %v1545_v50 = vand.u32 4294901760, %v4399_v22  ;;  %v4557_v18 = vpack.c.bf16 %v1497_v0, %v1494_v19  ;;  %v4576_v25 = vsub.f32 %v1449_v63, %v1497_v0  ;;  %v1622_v63 = vand.u32 4294901760, %v4567_v28 }
 0x22a   :  { %v3395_v19 = vpack.c.bf16 %v1610_v16, %v1603_v20  ;;  %v1616_v0 = vsub.f32 %v4565_v17, %v1615_v10  ;;  %v3407_v20 = vpack.c.bf16 %v4401_v14, %v4399_v22  ;;  %v3410_v16 = vpack.c.bf16 %v4407_v56, %v4403_v8 }
 0x22b   :  { %v1546_v36 = vsub.f32 %v4399_v22, %v1545_v50  ;;  %3381 = vmatpush3.bf16.msra.mxu0 %v4557_v18  ;;  %v4816_v32 = vand.u32 4294901760, %v4576_v25  ;;  %v3428_v21 = vpack.c.bf16 %v4576_v25, %v4574_v43  ;;  %v3461_v14 = vpack.c.bf16 %v1580_v48, %v1573_v45 }
 0x22c   :  { %3382 = vmatprep.subr.bf16.mxu0 %v4829_v6  ;;  %v1617_v13 = vand.u32 4294901760, %v1616_v0  ;;  %v3413_v0 = vpack.c.bf16 %v4415_v11, %v4409_v31  ;;  %v3464_v56 = vpack.c.bf16 %v1594_v58, %v1587_v51  ;;  %v3467_v8 = vpack.c.bf16 %v1608_v27, %v1601_v61 }
 0x22d   :  { %v1547_v12 = vand.u32 4294901760, %v1546_v36  ;;  %v1623_v36 = vsub.f32 %v4567_v28, %v1622_v63  ;;  %v1651_v1 = vsub.f32 %v4576_v25, %v4816_v32  ;;  %v3470_v11 = vpack.c.bf16 %v1622_v63, %v1615_v10 }
 0x22e   :  { %v4859_v31 = vand.u32 4294901760, %v4569_v29  ;;  %v4860_v22 = vand.u32 4294901760, %v4571_v24 }
 0x22f   :  { %v4581_v40 = vpack.c.bf16 %v1554_v9, %v1547_v12  ;;  %v1624_v12 = vand.u32 4294901760, %v1623_v36  ;;  %v4819_v9 = vand.u32 4294901760, %v4569_v29  ;;  %v1652_v26 = vand.u32 4294901760, %v1651_v1 }
 0x230   :  { %v3416_v36 = vpack.c.bf16 %v4421_v44, %v4419_v15  ;;  %v3473_v15 = vpack.c.bf16 %v4860_v22, %v4859_v31  ;;  %v4861_v44 = vand.u32 4294901760, %v4574_v43 }
 0x231   :  { %v3398_v59 = vpack.c.bf16 %v1624_v12, %v1617_v13  ;;  %v1630_v5 = vsub.f32 %v4569_v29, %v4819_v9  ;;  %v3404_v54 = vpack.c.bf16 %v1652_v26, %v1645_v57  ;;  %v3419_v13 = vpack.c.bf16 %v4425_v62, %v4423_v41 }
 0x232   :  { %v3422_v12 = vpack.c.bf16 %v4567_v28, %v4565_v17  ;;  %v4862_v41 = vand.u32 4294901760, %v4576_v25 }
 0x233   :  { %v1631_v53 = vand.u32 4294901760, %v1630_v5  ;;  %v3425_v5 = vpack.c.bf16 %v4571_v24, %v4569_v29 }
 0x234   :  { %v3476_v62 = vpack.c.bf16 %v4862_v41, %v4861_v44 }
 0x235   :  { %v3401_v42 = vpack.c.bf16 %v1638_v7, %v1631_v53  ;;  %v791_v53 = vld [vmem:[%s4778_s3] sm:$0xff] }
 0x2fc   :  { %v1429_v7 = vpop.f32.mrb[2].mxu1 }
 0x2fd   :  { %v3503_v4 = vadd.f32 %v1429_v7, %v791_v53  ;;  %v2859_v1 = vpop.f32.mrb[3].mxu1 }
 0x2ff   :  { %v1433_v57 = vmax.f32 %v3503_v4, 0.0 }
 0x301   :  { %v4656_v26 = vand.u32 4294901760, %v1433_v57 }
 0x303   :  { %v1533_v32 = vsub.f32 %v1433_v57, %v4656_v26 }
 0x305   :  { %v1534_v38 = vand.u32 4294901760, %v1533_v32 }
 0x307   :  { %v1535_v47 = vsub.f32 %v1533_v32, %v1534_v38 }
 0x309   :  { %v1536_v9 = vand.u32 4294901760, %v1535_v47 }
 0x30b   :  { %2893 = vmatmul.mubr.f32.vlgmr.msra.gmra.mrb[2].mxu0 %v1536_v9 }
 0x30c   :  { %3384 = vmatpush3.bf16.msra.mxu0 %v4581_v40  ;;  %2927 = vmatprep.mubr.msk.f32.mxu0 %vm3660_vm0, %v4831_v39  ;;  %v3455_v40 = vpack.c.bf16 %v1552_v49, %v1545_v50 }
 0x30d   :  { %3385 = vmatprep.subr.bf16.mxu0 %v4829_v6 }
 0x310   :  { %3387 = vmatpush3.bf16.msra.mxu0 %v3386_v23  ;;  %v3458_v23 = vpack.c.bf16 %v1566_v37, %v1559_v2 }
 0x311   :  { %3388 = vmatprep.subr.bf16.mxu0 %v4829_v6 }
 0x314   :  { %3390 = vmatpush3.bf16.msra.mxu0 %v3389_v3 }
 0x315   :  { %3391 = vmatprep.subr.bf16.mxu0 %v4829_v6 }
 0x318   :  { %3393 = vmatpush3.bf16.msra.mxu0 %v3392_v34 }
 0x319   :  { %3394 = vmatprep.subr.bf16.mxu0 %v4829_v6 }
 0x31c   :  { %3396 = vmatpush3.bf16.msra.mxu0 %v3395_v19 }
 0x31d   :  { %3397 = vmatprep.subr.bf16.mxu0 %v4829_v6 }
 0x320   :  { %3399 = vmatpush3.bf16.msra.mxu0 %v3398_v59 }
 0x321   :  { %3400 = vmatprep.subr.bf16.mxu0 %v4829_v6 }
 0x324   :  { %3402 = vmatpush3.bf16.msra.mxu0 %v3401_v42 }
 0x325   :  { %3403 = vmatprep.subr.bf16.mxu0 %v4829_v6 }
 0x328   :  { %3405 = vmatpush3.bf16.msra.mxu0 %v3404_v54 }
 0x329   :  { %3406 = vmatprep.subr.bf16.mxu0 %v4829_v6 }
 0x32b   :  { %2928 = vmatmul.mubr.f32.vlgmr.msra.gmra.mrb[2].mxu0 %v4656_v26 }
 0x32c   :  { %3408 = vmatpush3.bf16.msra.mxu0 %v3407_v20  ;;  %2962 = vmatprep.mubr.msk.f32.mxu0 %vm3660_vm0, %v4831_v39 }
 0x32d   :  { %3409 = vmatprep.subr.bf16.mxu0 %v4829_v6 }
 0x330   :  { %3411 = vmatpush3.bf16.msra.mxu0 %v3410_v16 }
 0x331   :  { %3412 = vmatprep.subr.bf16.mxu0 %v4829_v6 }
 0x334   :  { %3414 = vmatpush3.bf16.msra.mxu0 %v3413_v0 }
 0x335   :  { %3415 = vmatprep.subr.bf16.mxu0 %v4829_v6 }
 0x338   :  { %3417 = vmatpush3.bf16.msra.mxu0 %v3416_v36 }
 0x339   :  { %3418 = vmatprep.subr.bf16.mxu0 %v4829_v6 }
 0x33c   :  { %3420 = vmatpush3.bf16.msra.mxu0 %v3419_v13 }
 0x33d   :  { %3421 = vmatprep.subr.bf16.mxu0 %v4829_v6 }
 0x340   :  { %3423 = vmatpush3.bf16.msra.mxu0 %v3422_v12 }
 0x341   :  { %3424 = vmatprep.subr.bf16.mxu0 %v4829_v6 }
 0x344   :  { %3426 = vmatpush3.bf16.msra.mxu0 %v3425_v5 }
 0x345   :  { %3427 = vmatprep.subr.bf16.mxu0 %v4829_v6 }
 0x348   :  { %3429 = vmatpush3.bf16.msra.mxu0 %v3428_v21 }
 0x349   :  { %3430 = vmatprep.subr.bf16.mxu0 %v4829_v6 }
 0x34b   :  { %2963 = vmatmul.mubr.f32.vlgmr.msra.gmra.mrb[2].mxu0 %v1533_v32 }
 0x34c   :  { %3432 = vmatpush3.bf16.msra.mxu0 %v4397_v35  ;;  %2997 = vmatprep.mubr.msk.f32.mxu0 %vm3660_vm0, %v4831_v39 }
 0x34d   :  { %3433 = vmatprep.subr.bf16.mxu0 %v4829_v6 }
 0x350   :  { %3435 = vmatpush3.bf16.msra.mxu0 %v4405_v60 }
 0x351   :  { %3436 = vmatprep.subr.bf16.mxu0 %v4829_v6 }
 0x354   :  { %3438 = vmatpush3.bf16.msra.mxu0 %v4431_v30 }
 0x355   :  { %3439 = vmatprep.subr.bf16.mxu0 %v4829_v6 }
 0x358   :  { %3441 = vmatpush3.bf16.msra.mxu0 %v4439_v33 }
 0x359   :  { %3442 = vmatprep.subr.bf16.mxu0 %v4829_v6 }
 0x35c   :  { %3444 = vmatpush3.bf16.msra.mxu0 %v4447_v55 }
 0x35d   :  { %3445 = vmatprep.subr.bf16.mxu0 %v4829_v6 }
 0x360   :  { %3447 = vmatpush3.bf16.msra.mxu0 %v4547_v46 }
 0x361   :  { %3448 = vmatprep.subr.bf16.mxu0 %v4829_v6 }
 0x364   :  { %3450 = vmatpush3.bf16.msra.mxu0 %v4551_v52 }
 0x365   :  { %3451 = vmatprep.subr.bf16.mxu0 %v4829_v6 }
 0x368   :  { %3453 = vmatpush3.bf16.msra.mxu0 %v4557_v18 }
 0x369   :  { %3454 = vmatprep.subr.bf16.mxu0 %v4829_v6 }
 0x36b   :  { %2998 = vmatmul.mubr.f32.vlgmr.msra.gmra.mrb[2].mxu0 %v1534_v38 }
 0x36c   :  { %3456 = vmatpush3.bf16.msra.mxu0 %v3455_v40  ;;  %3032 = vmatprep.mubr.msk.f32.mxu0 %vm3660_vm0, %v4831_v39 }
 0x36d   :  { %3457 = vmatprep.subr.bf16.mxu0 %v4829_v6 }
 0x370   :  { %3459 = vmatpush3.bf16.msra.mxu0 %v3458_v23 }
 0x371   :  { %3460 = vmatprep.subr.bf16.mxu0 %v4829_v6 }
 0x374   :  { %3462 = vmatpush3.bf16.msra.mxu0 %v3461_v14 }
 0x375   :  { %3463 = vmatprep.subr.bf16.mxu0 %v4829_v6 }
 0x378   :  { %3465 = vmatpush3.bf16.msra.mxu0 %v3464_v56 }
 0x379   :  { %3466 = vmatprep.subr.bf16.mxu0 %v4829_v6 }
 0x37c   :  { %3468 = vmatpush3.bf16.msra.mxu0 %v3467_v8 }
 0x37d   :  { %3469 = vmatprep.subr.bf16.mxu0 %v4829_v6 }
 0x380   :  { %3471 = vmatpush3.bf16.msra.mxu0 %v3470_v11 }
 0x381   :  { %3472 = vmatprep.subr.bf16.mxu0 %v4829_v6 }
 0x384   :  { %3474 = vmatpush3.bf16.msra.mxu0 %v3473_v15 }
 0x385   :  { %3475 = vmatprep.subr.bf16.mxu0 %v4829_v6 }
 0x388   :  { %3477 = vmatpush3.bf16.msra.mxu0 %v3476_v62 }
 0x389   :  { %3478 = vmatprep.subr.bf16.mxu0 %v4829_v6 }
 0x38b   :  { %3033 = vmatmul.mubr.f32.vlgmr.msra.gmra.mrb[2].mxu0 %v4656_v26 }
 0x38c   :  { %3480 = vmatpush3.bf16.msra.mxu0 %v4397_v35  ;;  %3067 = vmatprep.mubr.msk.f32.mxu0 %vm3660_vm0, %v4831_v39  ;;  %v1450_v39 = vld [vmem:[%s4780_s5] sm:$0xff]  ;;  %s3623_s5 = scalar_lea.vmem %s2110_s28, 128 }
 0x38d   :  { %3481 = vmatprep.subr.bf16.mxu0 %v4829_v6  ;;  %p3624_p13 = scmp.ne.s32.totalorder %s2110_s28, %s3623_s5  ;;  %p3629_p1 = scmp.lt.s32.totalorder %s3623_s5, %s3623_s5 }
 0x38f   :  { %p3630_p2 = por %p3629_p1, %p3628_p0 }
 0x390   :  { %3483 = vmatpush3.bf16.msra.mxu0 %v4405_v60 }
 0x391   :  { %3484 = vmatprep.subr.bf16.mxu0 %v4829_v6  ;;  %p3631_p3 = pnand %p3630_p2, %p3624_p13 }
 0x394   :  { %3486 = vmatpush3.bf16.msra.mxu0 %v4431_v30 }
 0x395   :  { %3487 = vmatprep.subr.bf16.mxu0 %v4829_v6 }
 0x398   :  { %3489 = vmatpush3.bf16.msra.mxu0 %v4439_v33 }
 0x399   :  { %3490 = vmatprep.subr.bf16.mxu0 %v4829_v6 }
 0x39c   :  { %3492 = vmatpush3.bf16.msra.mxu0 %v4447_v55 }
 0x39d   :  { %3493 = vmatprep.subr.bf16.mxu0 %v4829_v6 }
 0x3a0   :  { %3495 = vmatpush3.bf16.msra.mxu0 %v4547_v46 }
 0x3a1   :  { %3496 = vmatprep.subr.bf16.mxu0 %v4829_v6 }
 0x3a4   :  { %3498 = vmatpush3.bf16.msra.mxu0 %v4551_v52 }
 0x3a5   :  { %3499 = vmatprep.subr.bf16.mxu0 %v4829_v6 }
 0x3a8   :  { %3501 = vmatpush3.bf16.msra.mxu0 %v4557_v18 }
 0x3ab   :  { %3068 = vmatmul.mubr.f32.vlgmr.msra.gmra.mrb[2].mxu0 %v4656_v26 }
 0x47e   :  { %v2088_v60 = vpop.f32.mrb[2].mxu0 }
 0x47f   :  { %v3504_v35 = vadd.f32 %v2088_v60, %v1450_v39  ;;  %v3069_v30 = vpop.f32.mrb[3].mxu0 }
 0x481   :  { %2092 = vmax.xlane.f32.xlu0 %v3504_v35 }
 0x50e   :  { %v2093_v33 = vpop.xlane.xlu0 %2092 }
 0x50f   :  { %v2094_v55 = vsub.f32 %v3504_v35, %v2093_v33 }
 0x511   :  { %v2095_v46 = vmul.f32 1.442695, %v2094_v55 }
 0x513   :  { %3543 = vpow2.f32 %v2095_v46 }
 0x51d   :  { %v3544_v50 = vpop.eup %3543 }
 0x51e   :  { %2097 = vadd.xlane.f32.xlu0 %v3544_v50 }
 0x5ab   :  { %v2098_v52 = vpop.xlane.xlu0 %2097 }
 0x5ac   :  { %3545 = vlog2.f32 %v2098_v52 }
 0x5b6   :  { %v3546_v6 = vpop.eup %3545 }
 0x5b7   :  { %v2100_v49 = vmul.f32 0.6931472, %v3546_v6 }
 0x5b9   :  { %v2101_v18 = vsub.f32 %v2094_v55, %v2100_v49 }
 0x5bb   :  { %2102 = vst [vmem:[#allocation10] sm:$0xff] %v2101_v18 }
 0x5bc   :  { %3634 = shalt.err (!%p3631_p3)
}
 0x5bd   :  { %s3635_s30 = scalar_lea.hbm %s4781_s6, 128 }
 0x5be   :  { %p3636_p4 = scmp.ne.s32.totalorder %s4781_s6, %s3635_s30  ;;  %p3639_p5 = scmp.lt.u32.totalorder %s3635_s30, %s4781_s6 }
 0x5c0   :  { %p3641_p6 = pnand %p3639_p5, %p3636_p4 }
 0x5c2   :  { %3644 = shalt.err (!%p3641_p6)
}
 0x5c3   :  { %2112 = dma.vmem_to_hbm [thread:$0]  %s2110_s28, 128, %s4781_s6, [#allocation6]  }
 0x5c4   :  { %3651 = dma.done.wait [#allocation6], 128  }
 0x5c5   :  { %3652 = vsyncadd [#allocation6], 4294967168 }
 0x5c6   :  { %2116 = vsyncpa [#allocation5], 1 }
 0x5c7   :  { %2117 = vsyncpa [#allocation8], 1 }
 0x5c8   :  { %2118 = vsyncpa [#allocation6], 1 }

</bundles_post_ra>
